<compile_context>
chip_gen: v5e
topology: v5e:2x2
jax: 0.10.0
libtpu: 0.0.40
codegen_flags: <defaults>
</compile_context>

<pallas_src>
import functools
import math

import jax
import jax.numpy as jnp
from jax.experimental import pallas as pl

# ----------------------------- config (small BERT) -------------------------
VOCAB = 96
HIDDEN = 32
HEADS = 4
HEAD_DIM = HIDDEN // HEADS
LAYERS = 2
INTERMEDIATE = 64
MAX_POS = 16
SEQ = 8
BATCH = 2
OUT_DIM = 8
EPS = 1e-12
ATT_SCALE = 1.0 / math.sqrt(HEAD_DIM)


# ------------------------------- fused kernel ------------------------------
def _layernorm(x, g, b):
    mu = jnp.mean(x, axis=-1, keepdims=True)
    var = jnp.mean(jnp.square(x - mu), axis=-1, keepdims=True)
    return (x - mu) * jax.lax.rsqrt(var + EPS) * g + b


def _bert_kernel(ids_ref, mask_ref,
                 word_emb_ref, pos_emb_ref, type_emb_ref,
                 emb_ln_g_ref, emb_ln_b_ref,
                 wqkv_ref, bqkv_ref, wo_ref, bo_ref,
                 ln1_g_ref, ln1_b_ref,
                 w1_ref, b1_ref, w2_ref, b2_ref,
                 ln2_g_ref, ln2_b_ref,
                 fc_w_ref, fc_b_ref,
                 o_ref, *, batch, seq):
    bs = batch * seq

    # ---- embeddings: token gather as one-hot matmul (MXU), + pos + type-0
    ids = ids_ref[...]                                        # (bs, 1) int32
    vocab_iota = jax.lax.broadcasted_iota(jnp.int32, (bs, VOCAB), 1)
    onehot = (vocab_iota == ids).astype(jnp.float32)          # (bs, VOCAB)
    word = jnp.dot(onehot, word_emb_ref[...],
                   preferred_element_type=jnp.float32)        # (bs, HIDDEN)
    pos = jnp.concatenate([pos_emb_ref[...]] * batch, axis=0)  # (bs, HIDDEN)
    emb = word + pos + type_emb_ref[...]                      # token_type_ids == 0
    h = _layernorm(emb, emb_ln_g_ref[...], emb_ln_b_ref[...])

    # ---- additive attention-mask bias: 0 attended, -1e9 masked
    mask = mask_ref[...].astype(jnp.float32)                  # (batch, seq)
    neg = (1.0 - mask) * jnp.float32(-1e9)

    n_layers = wqkv_ref.shape[0]
    for l in range(n_layers):
        x = h                                                 # (bs, HIDDEN)

        # fused QKV projection: one (bs, H) @ (H, 3H) matmul
        qkv = jnp.dot(x, wqkv_ref[l],
                      preferred_element_type=jnp.float32) + bqkv_ref[l]
        q = qkv[:, 0:HIDDEN]
        k = qkv[:, HIDDEN:2 * HIDDEN]
        v = qkv[:, 2 * HIDDEN:3 * HIDDEN]

        # attention: static per-(batch, head) 2-D slices, no transposes of
        # activations ever touch HBM; everything lives in vregs.
        ctx_rows = []
        for b in range(batch):
            r0 = b * seq
            bias_b = neg[b:b + 1, :]                          # (1, seq)
            head_ctx = []
            for hh in range(HEADS):
                c0 = hh * HEAD_DIM
                q_bh = q[r0:r0 + seq, c0:c0 + HEAD_DIM]       # (seq, Dh)
                k_bh = k[r0:r0 + seq, c0:c0 + HEAD_DIM]
                v_bh = v[r0:r0 + seq, c0:c0 + HEAD_DIM]
                s = jax.lax.dot_general(
                    q_bh, k_bh, (((1,), (1,)), ((), ())),
                    preferred_element_type=jnp.float32) * ATT_SCALE
                s = s + bias_b
                s = s - jnp.max(s, axis=-1, keepdims=True)
                p = jnp.exp(s)
                p = p * pl.reciprocal(jnp.sum(p, axis=-1, keepdims=True),
                                      approx=True)
                head_ctx.append(
                    jnp.dot(p, v_bh, preferred_element_type=jnp.float32))
            ctx_rows.append(jnp.concatenate(head_ctx, axis=-1))  # (seq, HIDDEN)
        ctx = jnp.concatenate(ctx_rows, axis=0)               # (bs, HIDDEN)

        attn_out = jnp.dot(ctx, wo_ref[l],
                           preferred_element_type=jnp.float32) + bo_ref[l]
        h1 = _layernorm(attn_out + x, ln1_g_ref[l], ln1_b_ref[l])

        ffn = jnp.dot(h1, w1_ref[l],
                      preferred_element_type=jnp.float32) + b1_ref[l]
        # TODO(synk): HF BERT uses exact erf-GELU; tanh approximation used here.
        ffn = jax.nn.gelu(ffn, approximate=True)
        ffn = jnp.dot(ffn, w2_ref[l],
                      preferred_element_type=jnp.float32) + b2_ref[l]
        h = _layernorm(ffn + h1, ln2_g_ref[l], ln2_b_ref[l])

    # ---- [CLS] (position 0 of every sequence) + final Linear
    h_cls = jnp.concatenate(
        [h[b * seq:b * seq + 1, :] for b in range(batch)], axis=0)  # (batch, H)
    out = jnp.dot(h_cls, fc_w_ref[...],
                  preferred_element_type=jnp.float32) + fc_b_ref[...]
    o_ref[...] = out.astype(o_ref.dtype)


def _full_spec(shape):
    n = len(shape)
    return pl.BlockSpec(tuple(shape), lambda n=n: (0,) * n)


# ------------------------------ parameter init ------------------------------
def init_params(key):
    def dense(k, fan_in, fan_out):
        return 0.02 * jax.random.normal(k, (fan_in, fan_out), jnp.float32)

    keys = jax.random.split(key, 4 + LAYERS)
    wqkv, wo, w1, w2 = [], [], [], []
    for i in range(LAYERS):
        lk = jax.random.split(keys[4 + i], 6)
        wq = dense(lk[0], HIDDEN, HIDDEN)
        wk = dense(lk[1], HIDDEN, HIDDEN)
        wv = dense(lk[2], HIDDEN, HIDDEN)
        wqkv.append(jnp.concatenate([wq, wk, wv], axis=1))    # (H, 3H)
        wo.append(dense(lk[3], HIDDEN, HIDDEN))
        w1.append(dense(lk[4], HIDDEN, INTERMEDIATE))
        w2.append(dense(lk[5], INTERMEDIATE, HIDDEN))

    return {
        "word_emb": 0.02 * jax.random.normal(keys[0], (VOCAB, HIDDEN), jnp.float32),
        "pos_emb": 0.02 * jax.random.normal(keys[1], (MAX_POS, HIDDEN), jnp.float32),
        "type_emb": 0.02 * jax.random.normal(keys[2], (2, HIDDEN), jnp.float32),
        "emb_ln_g": jnp.ones((1, HIDDEN), jnp.float32),
        "emb_ln_b": jnp.zeros((1, HIDDEN), jnp.float32),
        "wqkv": jnp.stack(wqkv),                              # (L, H, 3H)
        "bqkv": jnp.zeros((LAYERS, 1, 3 * HIDDEN), jnp.float32),
        "wo": jnp.stack(wo),                                  # (L, H, H)
        "bo": jnp.zeros((LAYERS, 1, HIDDEN), jnp.float32),
        "ln1_g": jnp.ones((LAYERS, 1, HIDDEN), jnp.float32),
        "ln1_b": jnp.zeros((LAYERS, 1, HIDDEN), jnp.float32),
        "w1": jnp.stack(w1),                                  # (L, H, I)
        "b1": jnp.zeros((LAYERS, 1, INTERMEDIATE), jnp.float32),
        "w2": jnp.stack(w2),                                  # (L, I, H)
        "b2": jnp.zeros((LAYERS, 1, HIDDEN), jnp.float32),
        "ln2_g": jnp.ones((LAYERS, 1, HIDDEN), jnp.float32),
        "ln2_b": jnp.zeros((LAYERS, 1, HIDDEN), jnp.float32),
        "fc_w": dense(keys[3], HIDDEN, OUT_DIM),
        "fc_b": jnp.zeros((1, OUT_DIM), jnp.float32),
    }


# -------------------------------- forward pass ------------------------------
@jax.jit
def bert_module_forward(params, inputs):
    # inputs: (B, 2, S) int32 — inputs[:, 0] = input_ids, inputs[:, 1] = attention_mask
    input_ids = inputs[:, 0].astype(jnp.int32)
    attention_mask = inputs[:, 1].astype(jnp.int32)
    B, S = input_ids.shape
    ids_col = input_ids.reshape(B * S, 1)

    args = (
        ids_col, attention_mask,
        params["word_emb"], params["pos_emb"][:S], params["type_emb"][0:1],
        params["emb_ln_g"], params["emb_ln_b"],
        params["wqkv"], params["bqkv"], params["wo"], params["bo"],
        params["ln1_g"], params["ln1_b"],
        params["w1"], params["b1"], params["w2"], params["b2"],
        params["ln2_g"], params["ln2_b"],
        params["fc_w"], params["fc_b"],
    )
    kernel = functools.partial(_bert_kernel, batch=int(B), seq=int(S))
    return pl.pallas_call(
        kernel,
        out_shape=jax.ShapeDtypeStruct((B, OUT_DIM), jnp.float32),
        in_specs=[_full_spec(a.shape) for a in args],
        out_specs=_full_spec((B, OUT_DIM)),
    )(*args)


# ------------------------------------ main -----------------------------------
if __name__ == "__main__":
    key = jax.random.PRNGKey(0)
    pkey, dkey = jax.random.split(key)
    params = init_params(pkey)

    input_ids = jax.random.randint(dkey, (BATCH, SEQ), 0, VOCAB, dtype=jnp.int32)
    attention_mask = jnp.concatenate(
        [jnp.ones((BATCH, SEQ - 2), jnp.int32), jnp.zeros((BATCH, 2), jnp.int32)],
        axis=1)
    inputs = jnp.stack([input_ids, attention_mask], axis=1)   # (B, 2, S)

    out = bert_module_forward(params, inputs)
    out = jax.block_until_ready(out)
    assert out.shape == (BATCH, OUT_DIM)
    assert bool(jnp.all(jnp.isfinite(out)))
    print("KERNEL_OK")
</pallas_src>

<mosaic_0001>
module attributes {stable_mosaic.version = 11 : i64} {
  func.func @_bert_kernel(%arg0: memref<16x1xi32, #tpu.memory_space<vmem>>, %arg1: memref<2x8xi32, #tpu.memory_space<vmem>>, %arg2: memref<96x32xf32, #tpu.memory_space<vmem>>, %arg3: memref<8x32xf32, #tpu.memory_space<vmem>>, %arg4: memref<1x32xf32, #tpu.memory_space<vmem>>, %arg5: memref<1x32xf32, #tpu.memory_space<vmem>>, %arg6: memref<1x32xf32, #tpu.memory_space<vmem>>, %arg7: memref<2x32x96xf32, #tpu.memory_space<vmem>>, %arg8: memref<2x1x96xf32, #tpu.memory_space<vmem>>, %arg9: memref<2x32x32xf32, #tpu.memory_space<vmem>>, %arg10: memref<2x1x32xf32, #tpu.memory_space<vmem>>, %arg11: memref<2x1x32xf32, #tpu.memory_space<vmem>>, %arg12: memref<2x1x32xf32, #tpu.memory_space<vmem>>, %arg13: memref<2x32x64xf32, #tpu.memory_space<vmem>>, %arg14: memref<2x1x64xf32, #tpu.memory_space<vmem>>, %arg15: memref<2x64x32xf32, #tpu.memory_space<vmem>>, %arg16: memref<2x1x32xf32, #tpu.memory_space<vmem>>, %arg17: memref<2x1x32xf32, #tpu.memory_space<vmem>>, %arg18: memref<2x1x32xf32, #tpu.memory_space<vmem>>, %arg19: memref<32x8xf32, #tpu.memory_space<vmem>>, %arg20: memref<1x8xf32, #tpu.memory_space<vmem>>, %arg21: memref<2x8xf32, #tpu.memory_space<vmem>>) attributes {dimension_semantics = [], scalar_prefetch = 0 : i64, scratch_operands = 0 : i64, tpu.core_type = #tpu.core_type<tc>} {
    %c0 = arith.constant 0 : index
    %c0_0 = arith.constant 0 : index
    %0 = vector.load %arg0[%c0, %c0_0] : memref<16x1xi32, #tpu.memory_space<vmem>>, vector<16x1xi32>
    %1 = tpu.iota {dimensions = array<i32: 1>} : vector<16x96xi32>
    %2 = vector.broadcast %0 : vector<16x1xi32> to vector<16x96xi32>
    %3 = arith.cmpi eq, %1, %2 : vector<16x96xi32>
    %4 = arith.extui %3 : vector<16x96xi1> to vector<16x96xi32>
    %5 = arith.sitofp %4 : vector<16x96xi32> to vector<16x96xf32>
    %c0_1 = arith.constant 0 : index
    %c0_2 = arith.constant 0 : index
    %6 = vector.load %arg2[%c0_1, %c0_2] : memref<96x32xf32, #tpu.memory_space<vmem>>, vector<96x32xf32>
    %cst = arith.constant dense<0.000000e+00> : vector<16x32xf32>
    %7 = tpu.matmul %5, %6, %cst {dimension_numbers = #tpu.dot_dimension_numbers<[1], [0], [0], [1], [0, 0, 1, 1], [], []>} : vector<16x96xf32>, vector<96x32xf32>, vector<16x32xf32> -> vector<16x32xf32>
    %c0_3 = arith.constant 0 : index
    %c0_4 = arith.constant 0 : index
    %8 = vector.load %arg3[%c0_3, %c0_4] : memref<8x32xf32, #tpu.memory_space<vmem>>, vector<8x32xf32>
    %9 = tpu.concatenate %8, %8 in 0 : vector<8x32xf32>, vector<8x32xf32> -> vector<16x32xf32>
    %10 = arith.addf %7, %9 : vector<16x32xf32>
    %c0_5 = arith.constant 0 : index
    %c0_6 = arith.constant 0 : index
    %11 = vector.load %arg4[%c0_5, %c0_6] : memref<1x32xf32, #tpu.memory_space<vmem>>, vector<1x32xf32>
    %12 = vector.broadcast %11 : vector<1x32xf32> to vector<16x32xf32>
    %13 = arith.addf %10, %12 : vector<16x32xf32>
    %c0_7 = arith.constant 0 : index
    %c0_8 = arith.constant 0 : index
    %14 = vector.load %arg5[%c0_7, %c0_8] : memref<1x32xf32, #tpu.memory_space<vmem>>, vector<1x32xf32>
    %c0_9 = arith.constant 0 : index
    %c0_10 = arith.constant 0 : index
    %15 = vector.load %arg6[%c0_9, %c0_10] : memref<1x32xf32, #tpu.memory_space<vmem>>, vector<1x32xf32>
    %cst_11 = arith.constant dense<0.000000e+00> : vector<16xf32>
    %16 = vector.multi_reduction <add>, %13, %cst_11 [1] : vector<16x32xf32> to vector<16xf32>
    %17 = vector.shape_cast %16 : vector<16xf32> to vector<16x1xf32>
    %cst_12 = arith.constant 3.200000e+01 : f32
    %18 = vector.broadcast %cst_12 : f32 to vector<16x1xf32>
    %19 = arith.divf %17, %18 : vector<16x1xf32>
    %20 = vector.broadcast %19 : vector<16x1xf32> to vector<16x32xf32>
    %21 = arith.subf %13, %20 : vector<16x32xf32>
    %22 = arith.mulf %21, %21 : vector<16x32xf32>
    %cst_13 = arith.constant dense<0.000000e+00> : vector<16xf32>
    %23 = vector.multi_reduction <add>, %22, %cst_13 [1] : vector<16x32xf32> to vector<16xf32>
    %24 = vector.shape_cast %23 : vector<16xf32> to vector<16x1xf32>
    %cst_14 = arith.constant 3.200000e+01 : f32
    %25 = vector.broadcast %cst_14 : f32 to vector<16x1xf32>
    %26 = arith.divf %24, %25 : vector<16x1xf32>
    %27 = vector.broadcast %19 : vector<16x1xf32> to vector<16x32xf32>
    %28 = arith.subf %13, %27 : vector<16x32xf32>
    %cst_15 = arith.constant 9.99999996E-13 : f32
    %29 = vector.broadcast %cst_15 : f32 to vector<16x1xf32>
    %30 = arith.addf %26, %29 : vector<16x1xf32>
    %31 = math.rsqrt %30 : vector<16x1xf32>
    %32 = vector.broadcast %31 : vector<16x1xf32> to vector<16x32xf32>
    %33 = arith.mulf %28, %32 : vector<16x32xf32>
    %34 = vector.broadcast %14 : vector<1x32xf32> to vector<16x32xf32>
    %35 = arith.mulf %33, %34 : vector<16x32xf32>
    %36 = vector.broadcast %15 : vector<1x32xf32> to vector<16x32xf32>
    %37 = arith.addf %35, %36 : vector<16x32xf32>
    %c0_16 = arith.constant 0 : index
    %c0_17 = arith.constant 0 : index
    %38 = vector.load %arg1[%c0_16, %c0_17] : memref<2x8xi32, #tpu.memory_space<vmem>>, vector<2x8xi32>
    %39 = arith.sitofp %38 : vector<2x8xi32> to vector<2x8xf32>
    %cst_18 = arith.constant 1.000000e+00 : f32
    %40 = vector.broadcast %cst_18 : f32 to vector<2x8xf32>
    %41 = arith.subf %40, %39 : vector<2x8xf32>
    %cst_19 = arith.constant -1.000000e+09 : f32
    %42 = vector.broadcast %cst_19 : f32 to vector<2x8xf32>
    %43 = arith.mulf %41, %42 : vector<2x8xf32>
    %c0_20 = arith.constant 0 : index
    %c0_21 = arith.constant 0 : index
    %c0_22 = arith.constant 0 : index
    %44 = vector.load %arg7[%c0_20, %c0_21, %c0_22] : memref<2x32x96xf32, #tpu.memory_space<vmem>>, vector<1x32x96xf32>
    %45 = vector.shape_cast %44 : vector<1x32x96xf32> to vector<32x96xf32>
    %cst_23 = arith.constant dense<0.000000e+00> : vector<16x96xf32>
    %46 = tpu.matmul %37, %45, %cst_23 {dimension_numbers = #tpu.dot_dimension_numbers<[1], [0], [0], [1], [0, 0, 1, 1], [], []>} : vector<16x32xf32>, vector<32x96xf32>, vector<16x96xf32> -> vector<16x96xf32>
    %c0_24 = arith.constant 0 : index
    %c0_25 = arith.constant 0 : index
    %c0_26 = arith.constant 0 : index
    %47 = vector.load %arg8[%c0_24, %c0_25, %c0_26] : memref<2x1x96xf32, #tpu.memory_space<vmem>>, vector<1x1x96xf32>
    %48 = vector.shape_cast %47 : vector<1x1x96xf32> to vector<1x96xf32>
    %49 = vector.broadcast %48 : vector<1x96xf32> to vector<16x96xf32>
    %50 = arith.addf %46, %49 : vector<16x96xf32>
    %51 = vector.extract_strided_slice %50 {offsets = [0, 0], sizes = [16, 32], strides = [1, 1]} : vector<16x96xf32> to vector<16x32xf32>
    %52 = vector.extract_strided_slice %50 {offsets = [0, 32], sizes = [16, 32], strides = [1, 1]} : vector<16x96xf32> to vector<16x32xf32>
    %53 = vector.extract_strided_slice %50 {offsets = [0, 64], sizes = [16, 32], strides = [1, 1]} : vector<16x96xf32> to vector<16x32xf32>
    %54 = vector.extract_strided_slice %43 {offsets = [0, 0], sizes = [1, 8], strides = [1, 1]} : vector<2x8xf32> to vector<1x8xf32>
    %55 = vector.extract_strided_slice %51 {offsets = [0, 0], sizes = [8, 8], strides = [1, 1]} : vector<16x32xf32> to vector<8x8xf32>
    %56 = vector.extract_strided_slice %52 {offsets = [0, 0], sizes = [8, 8], strides = [1, 1]} : vector<16x32xf32> to vector<8x8xf32>
    %57 = vector.extract_strided_slice %53 {offsets = [0, 0], sizes = [8, 8], strides = [1, 1]} : vector<16x32xf32> to vector<8x8xf32>
    %cst_27 = arith.constant dense<0.000000e+00> : vector<8x8xf32>
    %58 = tpu.matmul %55, %56, %cst_27 {dimension_numbers = #tpu.dot_dimension_numbers<[1], [1], [0], [0], [0, 0, 1, 0], [], []>} : vector<8x8xf32>, vector<8x8xf32>, vector<8x8xf32> -> vector<8x8xf32>
    %cst_28 = arith.constant 0.353553385 : f32
    %59 = vector.broadcast %cst_28 : f32 to vector<8x8xf32>
    %60 = arith.mulf %58, %59 : vector<8x8xf32>
    %61 = vector.broadcast %54 : vector<1x8xf32> to vector<8x8xf32>
    %62 = arith.addf %60, %61 : vector<8x8xf32>
    %cst_29 = arith.constant dense<0xFF800000> : vector<8xf32>
    %63 = vector.multi_reduction <maximumf>, %62, %cst_29 [1] : vector<8x8xf32> to vector<8xf32>
    %64 = vector.shape_cast %63 : vector<8xf32> to vector<8x1xf32>
    %65 = vector.broadcast %64 : vector<8x1xf32> to vector<8x8xf32>
    %66 = arith.subf %62, %65 : vector<8x8xf32>
    %67 = math.exp %66 : vector<8x8xf32>
    %cst_30 = arith.constant dense<0.000000e+00> : vector<8xf32>
    %68 = vector.multi_reduction <add>, %67, %cst_30 [1] : vector<8x8xf32> to vector<8xf32>
    %69 = vector.shape_cast %68 : vector<8xf32> to vector<8x1xf32>
    %70 = tpu.reciprocal %69 {approx = true} : vector<8x1xf32> -> vector<8x1xf32>
    %71 = vector.broadcast %70 : vector<8x1xf32> to vector<8x8xf32>
    %72 = arith.mulf %67, %71 : vector<8x8xf32>
    %cst_31 = arith.constant dense<0.000000e+00> : vector<8x8xf32>
    %73 = tpu.matmul %72, %57, %cst_31 {dimension_numbers = #tpu.dot_dimension_numbers<[1], [0], [0], [1], [0, 0, 1, 1], [], []>} : vector<8x8xf32>, vector<8x8xf32>, vector<8x8xf32> -> vector<8x8xf32>
    %74 = vector.extract_strided_slice %51 {offsets = [0, 8], sizes = [8, 8], strides = [1, 1]} : vector<16x32xf32> to vector<8x8xf32>
    %75 = vector.extract_strided_slice %52 {offsets = [0, 8], sizes = [8, 8], strides = [1, 1]} : vector<16x32xf32> to vector<8x8xf32>
    %76 = vector.extract_strided_slice %53 {offsets = [0, 8], sizes = [8, 8], strides = [1, 1]} : vector<16x32xf32> to vector<8x8xf32>
    %cst_32 = arith.constant dense<0.000000e+00> : vector<8x8xf32>
    %77 = tpu.matmul %74, %75, %cst_32 {dimension_numbers = #tpu.dot_dimension_numbers<[1], [1], [0], [0], [0, 0, 1, 0], [], []>} : vector<8x8xf32>, vector<8x8xf32>, vector<8x8xf32> -> vector<8x8xf32>
    %cst_33 = arith.constant 0.353553385 : f32
    %78 = vector.broadcast %cst_33 : f32 to vector<8x8xf32>
    %79 = arith.mulf %77, %78 : vector<8x8xf32>
    %80 = vector.broadcast %54 : vector<1x8xf32> to vector<8x8xf32>
    %81 = arith.addf %79, %80 : vector<8x8xf32>
    %cst_34 = arith.constant dense<0xFF800000> : vector<8xf32>
    %82 = vector.multi_reduction <maximumf>, %81, %cst_34 [1] : vector<8x8xf32> to vector<8xf32>
    %83 = vector.shape_cast %82 : vector<8xf32> to vector<8x1xf32>
    %84 = vector.broadcast %83 : vector<8x1xf32> to vector<8x8xf32>
    %85 = arith.subf %81, %84 : vector<8x8xf32>
    %86 = math.exp %85 : vector<8x8xf32>
    %cst_35 = arith.constant dense<0.000000e+00> : vector<8xf32>
    %87 = vector.multi_reduction <add>, %86, %cst_35 [1] : vector<8x8xf32> to vector<8xf32>
    %88 = vector.shape_cast %87 : vector<8xf32> to vector<8x1xf32>
    %89 = tpu.reciprocal %88 {approx = true} : vector<8x1xf32> -> vector<8x1xf32>
    %90 = vector.broadcast %89 : vector<8x1xf32> to vector<8x8xf32>
    %91 = arith.mulf %86, %90 : vector<8x8xf32>
    %cst_36 = arith.constant dense<0.000000e+00> : vector<8x8xf32>
    %92 = tpu.matmul %91, %76, %cst_36 {dimension_numbers = #tpu.dot_dimension_numbers<[1], [0], [0], [1], [0, 0, 1, 1], [], []>} : vector<8x8xf32>, vector<8x8xf32>, vector<8x8xf32> -> vector<8x8xf32>
    %93 = vector.extract_strided_slice %51 {offsets = [0, 16], sizes = [8, 8], strides = [1, 1]} : vector<16x32xf32> to vector<8x8xf32>
    %94 = vector.extract_strided_slice %52 {offsets = [0, 16], sizes = [8, 8], strides = [1, 1]} : vector<16x32xf32> to vector<8x8xf32>
    %95 = vector.extract_strided_slice %53 {offsets = [0, 16], sizes = [8, 8], strides = [1, 1]} : vector<16x32xf32> to vector<8x8xf32>
    %cst_37 = arith.constant dense<0.000000e+00> : vector<8x8xf32>
    %96 = tpu.matmul %93, %94, %cst_37 {dimension_numbers = #tpu.dot_dimension_numbers<[1], [1], [0], [0], [0, 0, 1, 0], [], []>} : vector<8x8xf32>, vector<8x8xf32>, vector<8x8xf32> -> vector<8x8xf32>
    %cst_38 = arith.constant 0.353553385 : f32
    %97 = vector.broadcast %cst_38 : f32 to vector<8x8xf32>
    %98 = arith.mulf %96, %97 : vector<8x8xf32>
    %99 = vector.broadcast %54 : vector<1x8xf32> to vector<8x8xf32>
    %100 = arith.addf %98, %99 : vector<8x8xf32>
    %cst_39 = arith.constant dense<0xFF800000> : vector<8xf32>
    %101 = vector.multi_reduction <maximumf>, %100, %cst_39 [1] : vector<8x8xf32> to vector<8xf32>
    %102 = vector.shape_cast %101 : vector<8xf32> to vector<8x1xf32>
    %103 = vector.broadcast %102 : vector<8x1xf32> to vector<8x8xf32>
    %104 = arith.subf %100, %103 : vector<8x8xf32>
    %105 = math.exp %104 : vector<8x8xf32>
    %cst_40 = arith.constant dense<0.000000e+00> : vector<8xf32>
    %106 = vector.multi_reduction <add>, %105, %cst_40 [1] : vector<8x8xf32> to vector<8xf32>
    %107 = vector.shape_cast %106 : vector<8xf32> to vector<8x1xf32>
    %108 = tpu.reciprocal %107 {approx = true} : vector<8x1xf32> -> vector<8x1xf32>
    %109 = vector.broadcast %108 : vector<8x1xf32> to vector<8x8xf32>
    %110 = arith.mulf %105, %109 : vector<8x8xf32>
    %cst_41 = arith.constant dense<0.000000e+00> : vector<8x8xf32>
    %111 = tpu.matmul %110, %95, %cst_41 {dimension_numbers = #tpu.dot_dimension_numbers<[1], [0], [0], [1], [0, 0, 1, 1], [], []>} : vector<8x8xf32>, vector<8x8xf32>, vector<8x8xf32> -> vector<8x8xf32>
    %112 = vector.extract_strided_slice %51 {offsets = [0, 24], sizes = [8, 8], strides = [1, 1]} : vector<16x32xf32> to vector<8x8xf32>
    %113 = vector.extract_strided_slice %52 {offsets = [0, 24], sizes = [8, 8], strides = [1, 1]} : vector<16x32xf32> to vector<8x8xf32>
    %114 = vector.extract_strided_slice %53 {offsets = [0, 24], sizes = [8, 8], strides = [1, 1]} : vector<16x32xf32> to vector<8x8xf32>
    %cst_42 = arith.constant dense<0.000000e+00> : vector<8x8xf32>
    %115 = tpu.matmul %112, %113, %cst_42 {dimension_numbers = #tpu.dot_dimension_numbers<[1], [1], [0], [0], [0, 0, 1, 0], [], []>} : vector<8x8xf32>, vector<8x8xf32>, vector<8x8xf32> -> vector<8x8xf32>
    %cst_43 = arith.constant 0.353553385 : f32
    %116 = vector.broadcast %cst_43 : f32 to vector<8x8xf32>
    %117 = arith.mulf %115, %116 : vector<8x8xf32>
    %118 = vector.broadcast %54 : vector<1x8xf32> to vector<8x8xf32>
    %119 = arith.addf %117, %118 : vector<8x8xf32>
    %cst_44 = arith.constant dense<0xFF800000> : vector<8xf32>
    %120 = vector.multi_reduction <maximumf>, %119, %cst_44 [1] : vector<8x8xf32> to vector<8xf32>
    %121 = vector.shape_cast %120 : vector<8xf32> to vector<8x1xf32>
    %122 = vector.broadcast %121 : vector<8x1xf32> to vector<8x8xf32>
    %123 = arith.subf %119, %122 : vector<8x8xf32>
    %124 = math.exp %123 : vector<8x8xf32>
    %cst_45 = arith.constant dense<0.000000e+00> : vector<8xf32>
    %125 = vector.multi_reduction <add>, %124, %cst_45 [1] : vector<8x8xf32> to vector<8xf32>
    %126 = vector.shape_cast %125 : vector<8xf32> to vector<8x1xf32>
    %127 = tpu.reciprocal %126 {approx = true} : vector<8x1xf32> -> vector<8x1xf32>
    %128 = vector.broadcast %127 : vector<8x1xf32> to vector<8x8xf32>
    %129 = arith.mulf %124, %128 : vector<8x8xf32>
    %cst_46 = arith.constant dense<0.000000e+00> : vector<8x8xf32>
    %130 = tpu.matmul %129, %114, %cst_46 {dimension_numbers = #tpu.dot_dimension_numbers<[1], [0], [0], [1], [0, 0, 1, 1], [], []>} : vector<8x8xf32>, vector<8x8xf32>, vector<8x8xf32> -> vector<8x8xf32>
    %131 = tpu.concatenate %73, %92, %111, %130 in 1 : vector<8x8xf32>, vector<8x8xf32>, vector<8x8xf32>, vector<8x8xf32> -> vector<8x32xf32>
    %132 = vector.extract_strided_slice %43 {offsets = [1, 0], sizes = [1, 8], strides = [1, 1]} : vector<2x8xf32> to vector<1x8xf32>
    %133 = vector.extract_strided_slice %51 {offsets = [8, 0], sizes = [8, 8], strides = [1, 1]} : vector<16x32xf32> to vector<8x8xf32>
    %134 = vector.extract_strided_slice %52 {offsets = [8, 0], sizes = [8, 8], strides = [1, 1]} : vector<16x32xf32> to vector<8x8xf32>
    %135 = vector.extract_strided_slice %53 {offsets = [8, 0], sizes = [8, 8], strides = [1, 1]} : vector<16x32xf32> to vector<8x8xf32>
    %cst_47 = arith.constant dense<0.000000e+00> : vector<8x8xf32>
    %136 = tpu.matmul %133, %134, %cst_47 {dimension_numbers = #tpu.dot_dimension_numbers<[1], [1], [0], [0], [0, 0, 1, 0], [], []>} : vector<8x8xf32>, vector<8x8xf32>, vector<8x8xf32> -> vector<8x8xf32>
    %cst_48 = arith.constant 0.353553385 : f32
    %137 = vector.broadcast %cst_48 : f32 to vector<8x8xf32>
    %138 = arith.mulf %136, %137 : vector<8x8xf32>
    %139 = vector.broadcast %132 : vector<1x8xf32> to vector<8x8xf32>
    %140 = arith.addf %138, %139 : vector<8x8xf32>
    %cst_49 = arith.constant dense<0xFF800000> : vector<8xf32>
    %141 = vector.multi_reduction <maximumf>, %140, %cst_49 [1] : vector<8x8xf32> to vector<8xf32>
    %142 = vector.shape_cast %141 : vector<8xf32> to vector<8x1xf32>
    %143 = vector.broadcast %142 : vector<8x1xf32> to vector<8x8xf32>
    %144 = arith.subf %140, %143 : vector<8x8xf32>
    %145 = math.exp %144 : vector<8x8xf32>
    %cst_50 = arith.constant dense<0.000000e+00> : vector<8xf32>
    %146 = vector.multi_reduction <add>, %145, %cst_50 [1] : vector<8x8xf32> to vector<8xf32>
    %147 = vector.shape_cast %146 : vector<8xf32> to vector<8x1xf32>
    %148 = tpu.reciprocal %147 {approx = true} : vector<8x1xf32> -> vector<8x1xf32>
    %149 = vector.broadcast %148 : vector<8x1xf32> to vector<8x8xf32>
    %150 = arith.mulf %145, %149 : vector<8x8xf32>
    %cst_51 = arith.constant dense<0.000000e+00> : vector<8x8xf32>
    %151 = tpu.matmul %150, %135, %cst_51 {dimension_numbers = #tpu.dot_dimension_numbers<[1], [0], [0], [1], [0, 0, 1, 1], [], []>} : vector<8x8xf32>, vector<8x8xf32>, vector<8x8xf32> -> vector<8x8xf32>
    %152 = vector.extract_strided_slice %51 {offsets = [8, 8], sizes = [8, 8], strides = [1, 1]} : vector<16x32xf32> to vector<8x8xf32>
    %153 = vector.extract_strided_slice %52 {offsets = [8, 8], sizes = [8, 8], strides = [1, 1]} : vector<16x32xf32> to vector<8x8xf32>
    %154 = vector.extract_strided_slice %53 {offsets = [8, 8], sizes = [8, 8], strides = [1, 1]} : vector<16x32xf32> to vector<8x8xf32>
    %cst_52 = arith.constant dense<0.000000e+00> : vector<8x8xf32>
    %155 = tpu.matmul %152, %153, %cst_52 {dimension_numbers = #tpu.dot_dimension_numbers<[1], [1], [0], [0], [0, 0, 1, 0], [], []>} : vector<8x8xf32>, vector<8x8xf32>, vector<8x8xf32> -> vector<8x8xf32>
    %cst_53 = arith.constant 0.353553385 : f32
    %156 = vector.broadcast %cst_53 : f32 to vector<8x8xf32>
    %157 = arith.mulf %155, %156 : vector<8x8xf32>
    %158 = vector.broadcast %132 : vector<1x8xf32> to vector<8x8xf32>
    %159 = arith.addf %157, %158 : vector<8x8xf32>
    %cst_54 = arith.constant dense<0xFF800000> : vector<8xf32>
    %160 = vector.multi_reduction <maximumf>, %159, %cst_54 [1] : vector<8x8xf32> to vector<8xf32>
    %161 = vector.shape_cast %160 : vector<8xf32> to vector<8x1xf32>
    %162 = vector.broadcast %161 : vector<8x1xf32> to vector<8x8xf32>
    %163 = arith.subf %159, %162 : vector<8x8xf32>
    %164 = math.exp %163 : vector<8x8xf32>
    %cst_55 = arith.constant dense<0.000000e+00> : vector<8xf32>
    %165 = vector.multi_reduction <add>, %164, %cst_55 [1] : vector<8x8xf32> to vector<8xf32>
    %166 = vector.shape_cast %165 : vector<8xf32> to vector<8x1xf32>
    %167 = tpu.reciprocal %166 {approx = true} : vector<8x1xf32> -> vector<8x1xf32>
    %168 = vector.broadcast %167 : vector<8x1xf32> to vector<8x8xf32>
    %169 = arith.mulf %164, %168 : vector<8x8xf32>
    %cst_56 = arith.constant dense<0.000000e+00> : vector<8x8xf32>
    %170 = tpu.matmul %169, %154, %cst_56 {dimension_numbers = #tpu.dot_dimension_numbers<[1], [0], [0], [1], [0, 0, 1, 1], [], []>} : vector<8x8xf32>, vector<8x8xf32>, vector<8x8xf32> -> vector<8x8xf32>
    %171 = vector.extract_strided_slice %51 {offsets = [8, 16], sizes = [8, 8], strides = [1, 1]} : vector<16x32xf32> to vector<8x8xf32>
    %172 = vector.extract_strided_slice %52 {offsets = [8, 16], sizes = [8, 8], strides = [1, 1]} : vector<16x32xf32> to vector<8x8xf32>
    %173 = vector.extract_strided_slice %53 {offsets = [8, 16], sizes = [8, 8], strides = [1, 1]} : vector<16x32xf32> to vector<8x8xf32>
    %cst_57 = arith.constant dense<0.000000e+00> : vector<8x8xf32>
    %174 = tpu.matmul %171, %172, %cst_57 {dimension_numbers = #tpu.dot_dimension_numbers<[1], [1], [0], [0], [0, 0, 1, 0], [], []>} : vector<8x8xf32>, vector<8x8xf32>, vector<8x8xf32> -> vector<8x8xf32>
    %cst_58 = arith.constant 0.353553385 : f32
    %175 = vector.broadcast %cst_58 : f32 to vector<8x8xf32>
    %176 = arith.mulf %174, %175 : vector<8x8xf32>
    %177 = vector.broadcast %132 : vector<1x8xf32> to vector<8x8xf32>
    %178 = arith.addf %176, %177 : vector<8x8xf32>
    %cst_59 = arith.constant dense<0xFF800000> : vector<8xf32>
    %179 = vector.multi_reduction <maximumf>, %178, %cst_59 [1] : vector<8x8xf32> to vector<8xf32>
    %180 = vector.shape_cast %179 : vector<8xf32> to vector<8x1xf32>
    %181 = vector.broadcast %180 : vector<8x1xf32> to vector<8x8xf32>
    %182 = arith.subf %178, %181 : vector<8x8xf32>
    %183 = math.exp %182 : vector<8x8xf32>
    %cst_60 = arith.constant dense<0.000000e+00> : vector<8xf32>
    %184 = vector.multi_reduction <add>, %183, %cst_60 [1] : vector<8x8xf32> to vector<8xf32>
    %185 = vector.shape_cast %184 : vector<8xf32> to vector<8x1xf32>
    %186 = tpu.reciprocal %185 {approx = true} : vector<8x1xf32> -> vector<8x1xf32>
    %187 = vector.broadcast %186 : vector<8x1xf32> to vector<8x8xf32>
    %188 = arith.mulf %183, %187 : vector<8x8xf32>
    %cst_61 = arith.constant dense<0.000000e+00> : vector<8x8xf32>
    %189 = tpu.matmul %188, %173, %cst_61 {dimension_numbers = #tpu.dot_dimension_numbers<[1], [0], [0], [1], [0, 0, 1, 1], [], []>} : vector<8x8xf32>, vector<8x8xf32>, vector<8x8xf32> -> vector<8x8xf32>
    %190 = vector.extract_strided_slice %51 {offsets = [8, 24], sizes = [8, 8], strides = [1, 1]} : vector<16x32xf32> to vector<8x8xf32>
    %191 = vector.extract_strided_slice %52 {offsets = [8, 24], sizes = [8, 8], strides = [1, 1]} : vector<16x32xf32> to vector<8x8xf32>
    %192 = vector.extract_strided_slice %53 {offsets = [8, 24], sizes = [8, 8], strides = [1, 1]} : vector<16x32xf32> to vector<8x8xf32>
    %cst_62 = arith.constant dense<0.000000e+00> : vector<8x8xf32>
    %193 = tpu.matmul %190, %191, %cst_62 {dimension_numbers = #tpu.dot_dimension_numbers<[1], [1], [0], [0], [0, 0, 1, 0], [], []>} : vector<8x8xf32>, vector<8x8xf32>, vector<8x8xf32> -> vector<8x8xf32>
    %cst_63 = arith.constant 0.353553385 : f32
    %194 = vector.broadcast %cst_63 : f32 to vector<8x8xf32>
    %195 = arith.mulf %193, %194 : vector<8x8xf32>
    %196 = vector.broadcast %132 : vector<1x8xf32> to vector<8x8xf32>
    %197 = arith.addf %195, %196 : vector<8x8xf32>
    %cst_64 = arith.constant dense<0xFF800000> : vector<8xf32>
    %198 = vector.multi_reduction <maximumf>, %197, %cst_64 [1] : vector<8x8xf32> to vector<8xf32>
    %199 = vector.shape_cast %198 : vector<8xf32> to vector<8x1xf32>
    %200 = vector.broadcast %199 : vector<8x1xf32> to vector<8x8xf32>
    %201 = arith.subf %197, %200 : vector<8x8xf32>
    %202 = math.exp %201 : vector<8x8xf32>
    %cst_65 = arith.constant dense<0.000000e+00> : vector<8xf32>
    %203 = vector.multi_reduction <add>, %202, %cst_65 [1] : vector<8x8xf32> to vector<8xf32>
    %204 = vector.shape_cast %203 : vector<8xf32> to vector<8x1xf32>
    %205 = tpu.reciprocal %204 {approx = true} : vector<8x1xf32> -> vector<8x1xf32>
    %206 = vector.broadcast %205 : vector<8x1xf32> to vector<8x8xf32>
    %207 = arith.mulf %202, %206 : vector<8x8xf32>
    %cst_66 = arith.constant dense<0.000000e+00> : vector<8x8xf32>
    %208 = tpu.matmul %207, %192, %cst_66 {dimension_numbers = #tpu.dot_dimension_numbers<[1], [0], [0], [1], [0, 0, 1, 1], [], []>} : vector<8x8xf32>, vector<8x8xf32>, vector<8x8xf32> -> vector<8x8xf32>
    %209 = tpu.concatenate %151, %170, %189, %208 in 1 : vector<8x8xf32>, vector<8x8xf32>, vector<8x8xf32>, vector<8x8xf32> -> vector<8x32xf32>
    %210 = tpu.concatenate %131, %209 in 0 : vector<8x32xf32>, vector<8x32xf32> -> vector<16x32xf32>
    %c0_67 = arith.constant 0 : index
    %c0_68 = arith.constant 0 : index
    %c0_69 = arith.constant 0 : index
    %211 = vector.load %arg9[%c0_67, %c0_68, %c0_69] : memref<2x32x32xf32, #tpu.memory_space<vmem>>, vector<1x32x32xf32>
    %212 = vector.shape_cast %211 : vector<1x32x32xf32> to vector<32x32xf32>
    %cst_70 = arith.constant dense<0.000000e+00> : vector<16x32xf32>
    %213 = tpu.matmul %210, %212, %cst_70 {dimension_numbers = #tpu.dot_dimension_numbers<[1], [0], [0], [1], [0, 0, 1, 1], [], []>} : vector<16x32xf32>, vector<32x32xf32>, vector<16x32xf32> -> vector<16x32xf32>
    %c0_71 = arith.constant 0 : index
    %c0_72 = arith.constant 0 : index
    %c0_73 = arith.constant 0 : index
    %214 = vector.load %arg10[%c0_71, %c0_72, %c0_73] : memref<2x1x32xf32, #tpu.memory_space<vmem>>, vector<1x1x32xf32>
    %215 = vector.shape_cast %214 : vector<1x1x32xf32> to vector<1x32xf32>
    %216 = vector.broadcast %215 : vector<1x32xf32> to vector<16x32xf32>
    %217 = arith.addf %213, %216 : vector<16x32xf32>
    %218 = arith.addf %217, %37 : vector<16x32xf32>
    %c0_74 = arith.constant 0 : index
    %c0_75 = arith.constant 0 : index
    %c0_76 = arith.constant 0 : index
    %219 = vector.load %arg11[%c0_74, %c0_75, %c0_76] : memref<2x1x32xf32, #tpu.memory_space<vmem>>, vector<1x1x32xf32>
    %220 = vector.shape_cast %219 : vector<1x1x32xf32> to vector<1x32xf32>
    %c0_77 = arith.constant 0 : index
    %c0_78 = arith.constant 0 : index
    %c0_79 = arith.constant 0 : index
    %221 = vector.load %arg12[%c0_77, %c0_78, %c0_79] : memref<2x1x32xf32, #tpu.memory_space<vmem>>, vector<1x1x32xf32>
    %222 = vector.shape_cast %221 : vector<1x1x32xf32> to vector<1x32xf32>
    %cst_80 = arith.constant dense<0.000000e+00> : vector<16xf32>
    %223 = vector.multi_reduction <add>, %218, %cst_80 [1] : vector<16x32xf32> to vector<16xf32>
    %224 = vector.shape_cast %223 : vector<16xf32> to vector<16x1xf32>
    %cst_81 = arith.constant 3.200000e+01 : f32
    %225 = vector.broadcast %cst_81 : f32 to vector<16x1xf32>
    %226 = arith.divf %224, %225 : vector<16x1xf32>
    %227 = vector.broadcast %226 : vector<16x1xf32> to vector<16x32xf32>
    %228 = arith.subf %218, %227 : vector<16x32xf32>
    %229 = arith.mulf %228, %228 : vector<16x32xf32>
    %cst_82 = arith.constant dense<0.000000e+00> : vector<16xf32>
    %230 = vector.multi_reduction <add>, %229, %cst_82 [1] : vector<16x32xf32> to vector<16xf32>
    %231 = vector.shape_cast %230 : vector<16xf32> to vector<16x1xf32>
    %cst_83 = arith.constant 3.200000e+01 : f32
    %232 = vector.broadcast %cst_83 : f32 to vector<16x1xf32>
    %233 = arith.divf %231, %232 : vector<16x1xf32>
    %234 = vector.broadcast %226 : vector<16x1xf32> to vector<16x32xf32>
    %235 = arith.subf %218, %234 : vector<16x32xf32>
    %cst_84 = arith.constant 9.99999996E-13 : f32
    %236 = vector.broadcast %cst_84 : f32 to vector<16x1xf32>
    %237 = arith.addf %233, %236 : vector<16x1xf32>
    %238 = math.rsqrt %237 : vector<16x1xf32>
    %239 = vector.broadcast %238 : vector<16x1xf32> to vector<16x32xf32>
    %240 = arith.mulf %235, %239 : vector<16x32xf32>
    %241 = vector.broadcast %220 : vector<1x32xf32> to vector<16x32xf32>
    %242 = arith.mulf %240, %241 : vector<16x32xf32>
    %243 = vector.broadcast %222 : vector<1x32xf32> to vector<16x32xf32>
    %244 = arith.addf %242, %243 : vector<16x32xf32>
    %c0_85 = arith.constant 0 : index
    %c0_86 = arith.constant 0 : index
    %c0_87 = arith.constant 0 : index
    %245 = vector.load %arg13[%c0_85, %c0_86, %c0_87] : memref<2x32x64xf32, #tpu.memory_space<vmem>>, vector<1x32x64xf32>
    %246 = vector.shape_cast %245 : vector<1x32x64xf32> to vector<32x64xf32>
    %cst_88 = arith.constant dense<0.000000e+00> : vector<16x64xf32>
    %247 = tpu.matmul %244, %246, %cst_88 {dimension_numbers = #tpu.dot_dimension_numbers<[1], [0], [0], [1], [0, 0, 1, 1], [], []>} : vector<16x32xf32>, vector<32x64xf32>, vector<16x64xf32> -> vector<16x64xf32>
    %c0_89 = arith.constant 0 : index
    %c0_90 = arith.constant 0 : index
    %c0_91 = arith.constant 0 : index
    %248 = vector.load %arg14[%c0_89, %c0_90, %c0_91] : memref<2x1x64xf32, #tpu.memory_space<vmem>>, vector<1x1x64xf32>
    %249 = vector.shape_cast %248 : vector<1x1x64xf32> to vector<1x64xf32>
    %250 = vector.broadcast %249 : vector<1x64xf32> to vector<16x64xf32>
    %251 = arith.addf %247, %250 : vector<16x64xf32>
    %252 = arith.mulf %251, %251 : vector<16x64xf32>
    %253 = arith.mulf %251, %252 : vector<16x64xf32>
    %cst_92 = arith.constant 4.471500e-02 : f32
    %254 = vector.broadcast %cst_92 : f32 to vector<16x64xf32>
    %255 = arith.mulf %254, %253 : vector<16x64xf32>
    %256 = arith.addf %251, %255 : vector<16x64xf32>
    %cst_93 = arith.constant 0.797884583 : f32
    %257 = vector.broadcast %cst_93 : f32 to vector<16x64xf32>
    %258 = arith.mulf %257, %256 : vector<16x64xf32>
    %259 = math.tanh %258 : vector<16x64xf32>
    %cst_94 = arith.constant 1.000000e+00 : f32
    %260 = vector.broadcast %cst_94 : f32 to vector<16x64xf32>
    %261 = arith.addf %260, %259 : vector<16x64xf32>
    %cst_95 = arith.constant 5.000000e-01 : f32
    %262 = vector.broadcast %cst_95 : f32 to vector<16x64xf32>
    %263 = arith.mulf %262, %261 : vector<16x64xf32>
    %264 = arith.mulf %251, %263 : vector<16x64xf32>
    %c0_96 = arith.constant 0 : index
    %c0_97 = arith.constant 0 : index
    %c0_98 = arith.constant 0 : index
    %265 = vector.load %arg15[%c0_96, %c0_97, %c0_98] : memref<2x64x32xf32, #tpu.memory_space<vmem>>, vector<1x64x32xf32>
    %266 = vector.shape_cast %265 : vector<1x64x32xf32> to vector<64x32xf32>
    %cst_99 = arith.constant dense<0.000000e+00> : vector<16x32xf32>
    %267 = tpu.matmul %264, %266, %cst_99 {dimension_numbers = #tpu.dot_dimension_numbers<[1], [0], [0], [1], [0, 0, 1, 1], [], []>} : vector<16x64xf32>, vector<64x32xf32>, vector<16x32xf32> -> vector<16x32xf32>
    %c0_100 = arith.constant 0 : index
    %c0_101 = arith.constant 0 : index
    %c0_102 = arith.constant 0 : index
    %268 = vector.load %arg16[%c0_100, %c0_101, %c0_102] : memref<2x1x32xf32, #tpu.memory_space<vmem>>, vector<1x1x32xf32>
    %269 = vector.shape_cast %268 : vector<1x1x32xf32> to vector<1x32xf32>
    %270 = vector.broadcast %269 : vector<1x32xf32> to vector<16x32xf32>
    %271 = arith.addf %267, %270 : vector<16x32xf32>
    %272 = arith.addf %271, %244 : vector<16x32xf32>
    %c0_103 = arith.constant 0 : index
    %c0_104 = arith.constant 0 : index
    %c0_105 = arith.constant 0 : index
    %273 = vector.load %arg17[%c0_103, %c0_104, %c0_105] : memref<2x1x32xf32, #tpu.memory_space<vmem>>, vector<1x1x32xf32>
    %274 = vector.shape_cast %273 : vector<1x1x32xf32> to vector<1x32xf32>
    %c0_106 = arith.constant 0 : index
    %c0_107 = arith.constant 0 : index
    %c0_108 = arith.constant 0 : index
    %275 = vector.load %arg18[%c0_106, %c0_107, %c0_108] : memref<2x1x32xf32, #tpu.memory_space<vmem>>, vector<1x1x32xf32>
    %276 = vector.shape_cast %275 : vector<1x1x32xf32> to vector<1x32xf32>
    %cst_109 = arith.constant dense<0.000000e+00> : vector<16xf32>
    %277 = vector.multi_reduction <add>, %272, %cst_109 [1] : vector<16x32xf32> to vector<16xf32>
    %278 = vector.shape_cast %277 : vector<16xf32> to vector<16x1xf32>
    %cst_110 = arith.constant 3.200000e+01 : f32
    %279 = vector.broadcast %cst_110 : f32 to vector<16x1xf32>
    %280 = arith.divf %278, %279 : vector<16x1xf32>
    %281 = vector.broadcast %280 : vector<16x1xf32> to vector<16x32xf32>
    %282 = arith.subf %272, %281 : vector<16x32xf32>
    %283 = arith.mulf %282, %282 : vector<16x32xf32>
    %cst_111 = arith.constant dense<0.000000e+00> : vector<16xf32>
    %284 = vector.multi_reduction <add>, %283, %cst_111 [1] : vector<16x32xf32> to vector<16xf32>
    %285 = vector.shape_cast %284 : vector<16xf32> to vector<16x1xf32>
    %cst_112 = arith.constant 3.200000e+01 : f32
    %286 = vector.broadcast %cst_112 : f32 to vector<16x1xf32>
    %287 = arith.divf %285, %286 : vector<16x1xf32>
    %288 = vector.broadcast %280 : vector<16x1xf32> to vector<16x32xf32>
    %289 = arith.subf %272, %288 : vector<16x32xf32>
    %cst_113 = arith.constant 9.99999996E-13 : f32
    %290 = vector.broadcast %cst_113 : f32 to vector<16x1xf32>
    %291 = arith.addf %287, %290 : vector<16x1xf32>
    %292 = math.rsqrt %291 : vector<16x1xf32>
    %293 = vector.broadcast %292 : vector<16x1xf32> to vector<16x32xf32>
    %294 = arith.mulf %289, %293 : vector<16x32xf32>
    %295 = vector.broadcast %274 : vector<1x32xf32> to vector<16x32xf32>
    %296 = arith.mulf %294, %295 : vector<16x32xf32>
    %297 = vector.broadcast %276 : vector<1x32xf32> to vector<16x32xf32>
    %298 = arith.addf %296, %297 : vector<16x32xf32>
    %c1 = arith.constant 1 : index
    %c0_114 = arith.constant 0 : index
    %c0_115 = arith.constant 0 : index
    %299 = vector.load %arg7[%c1, %c0_114, %c0_115] : memref<2x32x96xf32, #tpu.memory_space<vmem>>, vector<1x32x96xf32>
    %300 = vector.shape_cast %299 : vector<1x32x96xf32> to vector<32x96xf32>
    %cst_116 = arith.constant dense<0.000000e+00> : vector<16x96xf32>
    %301 = tpu.matmul %298, %300, %cst_116 {dimension_numbers = #tpu.dot_dimension_numbers<[1], [0], [0], [1], [0, 0, 1, 1], [], []>} : vector<16x32xf32>, vector<32x96xf32>, vector<16x96xf32> -> vector<16x96xf32>
    %c1_117 = arith.constant 1 : index
    %c0_118 = arith.constant 0 : index
    %c0_119 = arith.constant 0 : index
    %302 = vector.load %arg8[%c1_117, %c0_118, %c0_119] : memref<2x1x96xf32, #tpu.memory_space<vmem>>, vector<1x1x96xf32>
    %303 = vector.shape_cast %302 : vector<1x1x96xf32> to vector<1x96xf32>
    %304 = vector.broadcast %303 : vector<1x96xf32> to vector<16x96xf32>
    %305 = arith.addf %301, %304 : vector<16x96xf32>
    %306 = vector.extract_strided_slice %305 {offsets = [0, 0], sizes = [16, 32], strides = [1, 1]} : vector<16x96xf32> to vector<16x32xf32>
    %307 = vector.extract_strided_slice %305 {offsets = [0, 32], sizes = [16, 32], strides = [1, 1]} : vector<16x96xf32> to vector<16x32xf32>
    %308 = vector.extract_strided_slice %305 {offsets = [0, 64], sizes = [16, 32], strides = [1, 1]} : vector<16x96xf32> to vector<16x32xf32>
    %309 = vector.extract_strided_slice %43 {offsets = [0, 0], sizes = [1, 8], strides = [1, 1]} : vector<2x8xf32> to vector<1x8xf32>
    %310 = vector.extract_strided_slice %306 {offsets = [0, 0], sizes = [8, 8], strides = [1, 1]} : vector<16x32xf32> to vector<8x8xf32>
    %311 = vector.extract_strided_slice %307 {offsets = [0, 0], sizes = [8, 8], strides = [1, 1]} : vector<16x32xf32> to vector<8x8xf32>
    %312 = vector.extract_strided_slice %308 {offsets = [0, 0], sizes = [8, 8], strides = [1, 1]} : vector<16x32xf32> to vector<8x8xf32>
    %cst_120 = arith.constant dense<0.000000e+00> : vector<8x8xf32>
    %313 = tpu.matmul %310, %311, %cst_120 {dimension_numbers = #tpu.dot_dimension_numbers<[1], [1], [0], [0], [0, 0, 1, 0], [], []>} : vector<8x8xf32>, vector<8x8xf32>, vector<8x8xf32> -> vector<8x8xf32>
    %cst_121 = arith.constant 0.353553385 : f32
    %314 = vector.broadcast %cst_121 : f32 to vector<8x8xf32>
    %315 = arith.mulf %313, %314 : vector<8x8xf32>
    %316 = vector.broadcast %309 : vector<1x8xf32> to vector<8x8xf32>
    %317 = arith.addf %315, %316 : vector<8x8xf32>
    %cst_122 = arith.constant dense<0xFF800000> : vector<8xf32>
    %318 = vector.multi_reduction <maximumf>, %317, %cst_122 [1] : vector<8x8xf32> to vector<8xf32>
    %319 = vector.shape_cast %318 : vector<8xf32> to vector<8x1xf32>
    %320 = vector.broadcast %319 : vector<8x1xf32> to vector<8x8xf32>
    %321 = arith.subf %317, %320 : vector<8x8xf32>
    %322 = math.exp %321 : vector<8x8xf32>
    %cst_123 = arith.constant dense<0.000000e+00> : vector<8xf32>
    %323 = vector.multi_reduction <add>, %322, %cst_123 [1] : vector<8x8xf32> to vector<8xf32>
    %324 = vector.shape_cast %323 : vector<8xf32> to vector<8x1xf32>
    %325 = tpu.reciprocal %324 {approx = true} : vector<8x1xf32> -> vector<8x1xf32>
    %326 = vector.broadcast %325 : vector<8x1xf32> to vector<8x8xf32>
    %327 = arith.mulf %322, %326 : vector<8x8xf32>
    %cst_124 = arith.constant dense<0.000000e+00> : vector<8x8xf32>
    %328 = tpu.matmul %327, %312, %cst_124 {dimension_numbers = #tpu.dot_dimension_numbers<[1], [0], [0], [1], [0, 0, 1, 1], [], []>} : vector<8x8xf32>, vector<8x8xf32>, vector<8x8xf32> -> vector<8x8xf32>
    %329 = vector.extract_strided_slice %306 {offsets = [0, 8], sizes = [8, 8], strides = [1, 1]} : vector<16x32xf32> to vector<8x8xf32>
    %330 = vector.extract_strided_slice %307 {offsets = [0, 8], sizes = [8, 8], strides = [1, 1]} : vector<16x32xf32> to vector<8x8xf32>
    %331 = vector.extract_strided_slice %308 {offsets = [0, 8], sizes = [8, 8], strides = [1, 1]} : vector<16x32xf32> to vector<8x8xf32>
    %cst_125 = arith.constant dense<0.000000e+00> : vector<8x8xf32>
    %332 = tpu.matmul %329, %330, %cst_125 {dimension_numbers = #tpu.dot_dimension_numbers<[1], [1], [0], [0], [0, 0, 1, 0], [], []>} : vector<8x8xf32>, vector<8x8xf32>, vector<8x8xf32> -> vector<8x8xf32>
    %cst_126 = arith.constant 0.353553385 : f32
    %333 = vector.broadcast %cst_126 : f32 to vector<8x8xf32>
    %334 = arith.mulf %332, %333 : vector<8x8xf32>
    %335 = vector.broadcast %309 : vector<1x8xf32> to vector<8x8xf32>
    %336 = arith.addf %334, %335 : vector<8x8xf32>
    %cst_127 = arith.constant dense<0xFF800000> : vector<8xf32>
    %337 = vector.multi_reduction <maximumf>, %336, %cst_127 [1] : vector<8x8xf32> to vector<8xf32>
    %338 = vector.shape_cast %337 : vector<8xf32> to vector<8x1xf32>
    %339 = vector.broadcast %338 : vector<8x1xf32> to vector<8x8xf32>
    %340 = arith.subf %336, %339 : vector<8x8xf32>
    %341 = math.exp %340 : vector<8x8xf32>
    %cst_128 = arith.constant dense<0.000000e+00> : vector<8xf32>
    %342 = vector.multi_reduction <add>, %341, %cst_128 [1] : vector<8x8xf32> to vector<8xf32>
    %343 = vector.shape_cast %342 : vector<8xf32> to vector<8x1xf32>
    %344 = tpu.reciprocal %343 {approx = true} : vector<8x1xf32> -> vector<8x1xf32>
    %345 = vector.broadcast %344 : vector<8x1xf32> to vector<8x8xf32>
    %346 = arith.mulf %341, %345 : vector<8x8xf32>
    %cst_129 = arith.constant dense<0.000000e+00> : vector<8x8xf32>
    %347 = tpu.matmul %346, %331, %cst_129 {dimension_numbers = #tpu.dot_dimension_numbers<[1], [0], [0], [1], [0, 0, 1, 1], [], []>} : vector<8x8xf32>, vector<8x8xf32>, vector<8x8xf32> -> vector<8x8xf32>
    %348 = vector.extract_strided_slice %306 {offsets = [0, 16], sizes = [8, 8], strides = [1, 1]} : vector<16x32xf32> to vector<8x8xf32>
    %349 = vector.extract_strided_slice %307 {offsets = [0, 16], sizes = [8, 8], strides = [1, 1]} : vector<16x32xf32> to vector<8x8xf32>
    %350 = vector.extract_strided_slice %308 {offsets = [0, 16], sizes = [8, 8], strides = [1, 1]} : vector<16x32xf32> to vector<8x8xf32>
    %cst_130 = arith.constant dense<0.000000e+00> : vector<8x8xf32>
    %351 = tpu.matmul %348, %349, %cst_130 {dimension_numbers = #tpu.dot_dimension_numbers<[1], [1], [0], [0], [0, 0, 1, 0], [], []>} : vector<8x8xf32>, vector<8x8xf32>, vector<8x8xf32> -> vector<8x8xf32>
    %cst_131 = arith.constant 0.353553385 : f32
    %352 = vector.broadcast %cst_131 : f32 to vector<8x8xf32>
    %353 = arith.mulf %351, %352 : vector<8x8xf32>
    %354 = vector.broadcast %309 : vector<1x8xf32> to vector<8x8xf32>
    %355 = arith.addf %353, %354 : vector<8x8xf32>
    %cst_132 = arith.constant dense<0xFF800000> : vector<8xf32>
    %356 = vector.multi_reduction <maximumf>, %355, %cst_132 [1] : vector<8x8xf32> to vector<8xf32>
    %357 = vector.shape_cast %356 : vector<8xf32> to vector<8x1xf32>
    %358 = vector.broadcast %357 : vector<8x1xf32> to vector<8x8xf32>
    %359 = arith.subf %355, %358 : vector<8x8xf32>
    %360 = math.exp %359 : vector<8x8xf32>
    %cst_133 = arith.constant dense<0.000000e+00> : vector<8xf32>
    %361 = vector.multi_reduction <add>, %360, %cst_133 [1] : vector<8x8xf32> to vector<8xf32>
    %362 = vector.shape_cast %361 : vector<8xf32> to vector<8x1xf32>
    %363 = tpu.reciprocal %362 {approx = true} : vector<8x1xf32> -> vector<8x1xf32>
    %364 = vector.broadcast %363 : vector<8x1xf32> to vector<8x8xf32>
    %365 = arith.mulf %360, %364 : vector<8x8xf32>
    %cst_134 = arith.constant dense<0.000000e+00> : vector<8x8xf32>
    %366 = tpu.matmul %365, %350, %cst_134 {dimension_numbers = #tpu.dot_dimension_numbers<[1], [0], [0], [1], [0, 0, 1, 1], [], []>} : vector<8x8xf32>, vector<8x8xf32>, vector<8x8xf32> -> vector<8x8xf32>
    %367 = vector.extract_strided_slice %306 {offsets = [0, 24], sizes = [8, 8], strides = [1, 1]} : vector<16x32xf32> to vector<8x8xf32>
    %368 = vector.extract_strided_slice %307 {offsets = [0, 24], sizes = [8, 8], strides = [1, 1]} : vector<16x32xf32> to vector<8x8xf32>
    %369 = vector.extract_strided_slice %308 {offsets = [0, 24], sizes = [8, 8], strides = [1, 1]} : vector<16x32xf32> to vector<8x8xf32>
    %cst_135 = arith.constant dense<0.000000e+00> : vector<8x8xf32>
    %370 = tpu.matmul %367, %368, %cst_135 {dimension_numbers = #tpu.dot_dimension_numbers<[1], [1], [0], [0], [0, 0, 1, 0], [], []>} : vector<8x8xf32>, vector<8x8xf32>, vector<8x8xf32> -> vector<8x8xf32>
    %cst_136 = arith.constant 0.353553385 : f32
    %371 = vector.broadcast %cst_136 : f32 to vector<8x8xf32>
    %372 = arith.mulf %370, %371 : vector<8x8xf32>
    %373 = vector.broadcast %309 : vector<1x8xf32> to vector<8x8xf32>
    %374 = arith.addf %372, %373 : vector<8x8xf32>
    %cst_137 = arith.constant dense<0xFF800000> : vector<8xf32>
    %375 = vector.multi_reduction <maximumf>, %374, %cst_137 [1] : vector<8x8xf32> to vector<8xf32>
    %376 = vector.shape_cast %375 : vector<8xf32> to vector<8x1xf32>
    %377 = vector.broadcast %376 : vector<8x1xf32> to vector<8x8xf32>
    %378 = arith.subf %374, %377 : vector<8x8xf32>
    %379 = math.exp %378 : vector<8x8xf32>
    %cst_138 = arith.constant dense<0.000000e+00> : vector<8xf32>
    %380 = vector.multi_reduction <add>, %379, %cst_138 [1] : vector<8x8xf32> to vector<8xf32>
    %381 = vector.shape_cast %380 : vector<8xf32> to vector<8x1xf32>
    %382 = tpu.reciprocal %381 {approx = true} : vector<8x1xf32> -> vector<8x1xf32>
    %383 = vector.broadcast %382 : vector<8x1xf32> to vector<8x8xf32>
    %384 = arith.mulf %379, %383 : vector<8x8xf32>
    %cst_139 = arith.constant dense<0.000000e+00> : vector<8x8xf32>
    %385 = tpu.matmul %384, %369, %cst_139 {dimension_numbers = #tpu.dot_dimension_numbers<[1], [0], [0], [1], [0, 0, 1, 1], [], []>} : vector<8x8xf32>, vector<8x8xf32>, vector<8x8xf32> -> vector<8x8xf32>
    %386 = tpu.concatenate %328, %347, %366, %385 in 1 : vector<8x8xf32>, vector<8x8xf32>, vector<8x8xf32>, vector<8x8xf32> -> vector<8x32xf32>
    %387 = vector.extract_strided_slice %43 {offsets = [1, 0], sizes = [1, 8], strides = [1, 1]} : vector<2x8xf32> to vector<1x8xf32>
    %388 = vector.extract_strided_slice %306 {offsets = [8, 0], sizes = [8, 8], strides = [1, 1]} : vector<16x32xf32> to vector<8x8xf32>
    %389 = vector.extract_strided_slice %307 {offsets = [8, 0], sizes = [8, 8], strides = [1, 1]} : vector<16x32xf32> to vector<8x8xf32>
    %390 = vector.extract_strided_slice %308 {offsets = [8, 0], sizes = [8, 8], strides = [1, 1]} : vector<16x32xf32> to vector<8x8xf32>
    %cst_140 = arith.constant dense<0.000000e+00> : vector<8x8xf32>
    %391 = tpu.matmul %388, %389, %cst_140 {dimension_numbers = #tpu.dot_dimension_numbers<[1], [1], [0], [0], [0, 0, 1, 0], [], []>} : vector<8x8xf32>, vector<8x8xf32>, vector<8x8xf32> -> vector<8x8xf32>
    %cst_141 = arith.constant 0.353553385 : f32
    %392 = vector.broadcast %cst_141 : f32 to vector<8x8xf32>
    %393 = arith.mulf %391, %392 : vector<8x8xf32>
    %394 = vector.broadcast %387 : vector<1x8xf32> to vector<8x8xf32>
    %395 = arith.addf %393, %394 : vector<8x8xf32>
    %cst_142 = arith.constant dense<0xFF800000> : vector<8xf32>
    %396 = vector.multi_reduction <maximumf>, %395, %cst_142 [1] : vector<8x8xf32> to vector<8xf32>
    %397 = vector.shape_cast %396 : vector<8xf32> to vector<8x1xf32>
    %398 = vector.broadcast %397 : vector<8x1xf32> to vector<8x8xf32>
    %399 = arith.subf %395, %398 : vector<8x8xf32>
    %400 = math.exp %399 : vector<8x8xf32>
    %cst_143 = arith.constant dense<0.000000e+00> : vector<8xf32>
    %401 = vector.multi_reduction <add>, %400, %cst_143 [1] : vector<8x8xf32> to vector<8xf32>
    %402 = vector.shape_cast %401 : vector<8xf32> to vector<8x1xf32>
    %403 = tpu.reciprocal %402 {approx = true} : vector<8x1xf32> -> vector<8x1xf32>
    %404 = vector.broadcast %403 : vector<8x1xf32> to vector<8x8xf32>
    %405 = arith.mulf %400, %404 : vector<8x8xf32>
    %cst_144 = arith.constant dense<0.000000e+00> : vector<8x8xf32>
    %406 = tpu.matmul %405, %390, %cst_144 {dimension_numbers = #tpu.dot_dimension_numbers<[1], [0], [0], [1], [0, 0, 1, 1], [], []>} : vector<8x8xf32>, vector<8x8xf32>, vector<8x8xf32> -> vector<8x8xf32>
    %407 = vector.extract_strided_slice %306 {offsets = [8, 8], sizes = [8, 8], strides = [1, 1]} : vector<16x32xf32> to vector<8x8xf32>
    %408 = vector.extract_strided_slice %307 {offsets = [8, 8], sizes = [8, 8], strides = [1, 1]} : vector<16x32xf32> to vector<8x8xf32>
    %409 = vector.extract_strided_slice %308 {offsets = [8, 8], sizes = [8, 8], strides = [1, 1]} : vector<16x32xf32> to vector<8x8xf32>
    %cst_145 = arith.constant dense<0.000000e+00> : vector<8x8xf32>
    %410 = tpu.matmul %407, %408, %cst_145 {dimension_numbers = #tpu.dot_dimension_numbers<[1], [1], [0], [0], [0, 0, 1, 0], [], []>} : vector<8x8xf32>, vector<8x8xf32>, vector<8x8xf32> -> vector<8x8xf32>
    %cst_146 = arith.constant 0.353553385 : f32
    %411 = vector.broadcast %cst_146 : f32 to vector<8x8xf32>
    %412 = arith.mulf %410, %411 : vector<8x8xf32>
    %413 = vector.broadcast %387 : vector<1x8xf32> to vector<8x8xf32>
    %414 = arith.addf %412, %413 : vector<8x8xf32>
    %cst_147 = arith.constant dense<0xFF800000> : vector<8xf32>
    %415 = vector.multi_reduction <maximumf>, %414, %cst_147 [1] : vector<8x8xf32> to vector<8xf32>
    %416 = vector.shape_cast %415 : vector<8xf32> to vector<8x1xf32>
    %417 = vector.broadcast %416 : vector<8x1xf32> to vector<8x8xf32>
    %418 = arith.subf %414, %417 : vector<8x8xf32>
    %419 = math.exp %418 : vector<8x8xf32>
    %cst_148 = arith.constant dense<0.000000e+00> : vector<8xf32>
    %420 = vector.multi_reduction <add>, %419, %cst_148 [1] : vector<8x8xf32> to vector<8xf32>
    %421 = vector.shape_cast %420 : vector<8xf32> to vector<8x1xf32>
    %422 = tpu.reciprocal %421 {approx = true} : vector<8x1xf32> -> vector<8x1xf32>
    %423 = vector.broadcast %422 : vector<8x1xf32> to vector<8x8xf32>
    %424 = arith.mulf %419, %423 : vector<8x8xf32>
    %cst_149 = arith.constant dense<0.000000e+00> : vector<8x8xf32>
    %425 = tpu.matmul %424, %409, %cst_149 {dimension_numbers = #tpu.dot_dimension_numbers<[1], [0], [0], [1], [0, 0, 1, 1], [], []>} : vector<8x8xf32>, vector<8x8xf32>, vector<8x8xf32> -> vector<8x8xf32>
    %426 = vector.extract_strided_slice %306 {offsets = [8, 16], sizes = [8, 8], strides = [1, 1]} : vector<16x32xf32> to vector<8x8xf32>
    %427 = vector.extract_strided_slice %307 {offsets = [8, 16], sizes = [8, 8], strides = [1, 1]} : vector<16x32xf32> to vector<8x8xf32>
    %428 = vector.extract_strided_slice %308 {offsets = [8, 16], sizes = [8, 8], strides = [1, 1]} : vector<16x32xf32> to vector<8x8xf32>
    %cst_150 = arith.constant dense<0.000000e+00> : vector<8x8xf32>
    %429 = tpu.matmul %426, %427, %cst_150 {dimension_numbers = #tpu.dot_dimension_numbers<[1], [1], [0], [0], [0, 0, 1, 0], [], []>} : vector<8x8xf32>, vector<8x8xf32>, vector<8x8xf32> -> vector<8x8xf32>
    %cst_151 = arith.constant 0.353553385 : f32
    %430 = vector.broadcast %cst_151 : f32 to vector<8x8xf32>
    %431 = arith.mulf %429, %430 : vector<8x8xf32>
    %432 = vector.broadcast %387 : vector<1x8xf32> to vector<8x8xf32>
    %433 = arith.addf %431, %432 : vector<8x8xf32>
    %cst_152 = arith.constant dense<0xFF800000> : vector<8xf32>
    %434 = vector.multi_reduction <maximumf>, %433, %cst_152 [1] : vector<8x8xf32> to vector<8xf32>
    %435 = vector.shape_cast %434 : vector<8xf32> to vector<8x1xf32>
    %436 = vector.broadcast %435 : vector<8x1xf32> to vector<8x8xf32>
    %437 = arith.subf %433, %436 : vector<8x8xf32>
    %438 = math.exp %437 : vector<8x8xf32>
    %cst_153 = arith.constant dense<0.000000e+00> : vector<8xf32>
    %439 = vector.multi_reduction <add>, %438, %cst_153 [1] : vector<8x8xf32> to vector<8xf32>
    %440 = vector.shape_cast %439 : vector<8xf32> to vector<8x1xf32>
    %441 = tpu.reciprocal %440 {approx = true} : vector<8x1xf32> -> vector<8x1xf32>
    %442 = vector.broadcast %441 : vector<8x1xf32> to vector<8x8xf32>
    %443 = arith.mulf %438, %442 : vector<8x8xf32>
    %cst_154 = arith.constant dense<0.000000e+00> : vector<8x8xf32>
    %444 = tpu.matmul %443, %428, %cst_154 {dimension_numbers = #tpu.dot_dimension_numbers<[1], [0], [0], [1], [0, 0, 1, 1], [], []>} : vector<8x8xf32>, vector<8x8xf32>, vector<8x8xf32> -> vector<8x8xf32>
    %445 = vector.extract_strided_slice %306 {offsets = [8, 24], sizes = [8, 8], strides = [1, 1]} : vector<16x32xf32> to vector<8x8xf32>
    %446 = vector.extract_strided_slice %307 {offsets = [8, 24], sizes = [8, 8], strides = [1, 1]} : vector<16x32xf32> to vector<8x8xf32>
    %447 = vector.extract_strided_slice %308 {offsets = [8, 24], sizes = [8, 8], strides = [1, 1]} : vector<16x32xf32> to vector<8x8xf32>
    %cst_155 = arith.constant dense<0.000000e+00> : vector<8x8xf32>
    %448 = tpu.matmul %445, %446, %cst_155 {dimension_numbers = #tpu.dot_dimension_numbers<[1], [1], [0], [0], [0, 0, 1, 0], [], []>} : vector<8x8xf32>, vector<8x8xf32>, vector<8x8xf32> -> vector<8x8xf32>
    %cst_156 = arith.constant 0.353553385 : f32
    %449 = vector.broadcast %cst_156 : f32 to vector<8x8xf32>
    %450 = arith.mulf %448, %449 : vector<8x8xf32>
    %451 = vector.broadcast %387 : vector<1x8xf32> to vector<8x8xf32>
    %452 = arith.addf %450, %451 : vector<8x8xf32>
    %cst_157 = arith.constant dense<0xFF800000> : vector<8xf32>
    %453 = vector.multi_reduction <maximumf>, %452, %cst_157 [1] : vector<8x8xf32> to vector<8xf32>
    %454 = vector.shape_cast %453 : vector<8xf32> to vector<8x1xf32>
    %455 = vector.broadcast %454 : vector<8x1xf32> to vector<8x8xf32>
    %456 = arith.subf %452, %455 : vector<8x8xf32>
    %457 = math.exp %456 : vector<8x8xf32>
    %cst_158 = arith.constant dense<0.000000e+00> : vector<8xf32>
    %458 = vector.multi_reduction <add>, %457, %cst_158 [1] : vector<8x8xf32> to vector<8xf32>
    %459 = vector.shape_cast %458 : vector<8xf32> to vector<8x1xf32>
    %460 = tpu.reciprocal %459 {approx = true} : vector<8x1xf32> -> vector<8x1xf32>
    %461 = vector.broadcast %460 : vector<8x1xf32> to vector<8x8xf32>
    %462 = arith.mulf %457, %461 : vector<8x8xf32>
    %cst_159 = arith.constant dense<0.000000e+00> : vector<8x8xf32>
    %463 = tpu.matmul %462, %447, %cst_159 {dimension_numbers = #tpu.dot_dimension_numbers<[1], [0], [0], [1], [0, 0, 1, 1], [], []>} : vector<8x8xf32>, vector<8x8xf32>, vector<8x8xf32> -> vector<8x8xf32>
    %464 = tpu.concatenate %406, %425, %444, %463 in 1 : vector<8x8xf32>, vector<8x8xf32>, vector<8x8xf32>, vector<8x8xf32> -> vector<8x32xf32>
    %465 = tpu.concatenate %386, %464 in 0 : vector<8x32xf32>, vector<8x32xf32> -> vector<16x32xf32>
    %c1_160 = arith.constant 1 : index
    %c0_161 = arith.constant 0 : index
    %c0_162 = arith.constant 0 : index
    %466 = vector.load %arg9[%c1_160, %c0_161, %c0_162] : memref<2x32x32xf32, #tpu.memory_space<vmem>>, vector<1x32x32xf32>
    %467 = vector.shape_cast %466 : vector<1x32x32xf32> to vector<32x32xf32>
    %cst_163 = arith.constant dense<0.000000e+00> : vector<16x32xf32>
    %468 = tpu.matmul %465, %467, %cst_163 {dimension_numbers = #tpu.dot_dimension_numbers<[1], [0], [0], [1], [0, 0, 1, 1], [], []>} : vector<16x32xf32>, vector<32x32xf32>, vector<16x32xf32> -> vector<16x32xf32>
    %c1_164 = arith.constant 1 : index
    %c0_165 = arith.constant 0 : index
    %c0_166 = arith.constant 0 : index
    %469 = vector.load %arg10[%c1_164, %c0_165, %c0_166] : memref<2x1x32xf32, #tpu.memory_space<vmem>>, vector<1x1x32xf32>
    %470 = vector.shape_cast %469 : vector<1x1x32xf32> to vector<1x32xf32>
    %471 = vector.broadcast %470 : vector<1x32xf32> to vector<16x32xf32>
    %472 = arith.addf %468, %471 : vector<16x32xf32>
    %473 = arith.addf %472, %298 : vector<16x32xf32>
    %c1_167 = arith.constant 1 : index
    %c0_168 = arith.constant 0 : index
    %c0_169 = arith.constant 0 : index
    %474 = vector.load %arg11[%c1_167, %c0_168, %c0_169] : memref<2x1x32xf32, #tpu.memory_space<vmem>>, vector<1x1x32xf32>
    %475 = vector.shape_cast %474 : vector<1x1x32xf32> to vector<1x32xf32>
    %c1_170 = arith.constant 1 : index
    %c0_171 = arith.constant 0 : index
    %c0_172 = arith.constant 0 : index
    %476 = vector.load %arg12[%c1_170, %c0_171, %c0_172] : memref<2x1x32xf32, #tpu.memory_space<vmem>>, vector<1x1x32xf32>
    %477 = vector.shape_cast %476 : vector<1x1x32xf32> to vector<1x32xf32>
    %cst_173 = arith.constant dense<0.000000e+00> : vector<16xf32>
    %478 = vector.multi_reduction <add>, %473, %cst_173 [1] : vector<16x32xf32> to vector<16xf32>
    %479 = vector.shape_cast %478 : vector<16xf32> to vector<16x1xf32>
    %cst_174 = arith.constant 3.200000e+01 : f32
    %480 = vector.broadcast %cst_174 : f32 to vector<16x1xf32>
    %481 = arith.divf %479, %480 : vector<16x1xf32>
    %482 = vector.broadcast %481 : vector<16x1xf32> to vector<16x32xf32>
    %483 = arith.subf %473, %482 : vector<16x32xf32>
    %484 = arith.mulf %483, %483 : vector<16x32xf32>
    %cst_175 = arith.constant dense<0.000000e+00> : vector<16xf32>
    %485 = vector.multi_reduction <add>, %484, %cst_175 [1] : vector<16x32xf32> to vector<16xf32>
    %486 = vector.shape_cast %485 : vector<16xf32> to vector<16x1xf32>
    %cst_176 = arith.constant 3.200000e+01 : f32
    %487 = vector.broadcast %cst_176 : f32 to vector<16x1xf32>
    %488 = arith.divf %486, %487 : vector<16x1xf32>
    %489 = vector.broadcast %481 : vector<16x1xf32> to vector<16x32xf32>
    %490 = arith.subf %473, %489 : vector<16x32xf32>
    %cst_177 = arith.constant 9.99999996E-13 : f32
    %491 = vector.broadcast %cst_177 : f32 to vector<16x1xf32>
    %492 = arith.addf %488, %491 : vector<16x1xf32>
    %493 = math.rsqrt %492 : vector<16x1xf32>
    %494 = vector.broadcast %493 : vector<16x1xf32> to vector<16x32xf32>
    %495 = arith.mulf %490, %494 : vector<16x32xf32>
    %496 = vector.broadcast %475 : vector<1x32xf32> to vector<16x32xf32>
    %497 = arith.mulf %495, %496 : vector<16x32xf32>
    %498 = vector.broadcast %477 : vector<1x32xf32> to vector<16x32xf32>
    %499 = arith.addf %497, %498 : vector<16x32xf32>
    %c1_178 = arith.constant 1 : index
    %c0_179 = arith.constant 0 : index
    %c0_180 = arith.constant 0 : index
    %500 = vector.load %arg13[%c1_178, %c0_179, %c0_180] : memref<2x32x64xf32, #tpu.memory_space<vmem>>, vector<1x32x64xf32>
    %501 = vector.shape_cast %500 : vector<1x32x64xf32> to vector<32x64xf32>
    %cst_181 = arith.constant dense<0.000000e+00> : vector<16x64xf32>
    %502 = tpu.matmul %499, %501, %cst_181 {dimension_numbers = #tpu.dot_dimension_numbers<[1], [0], [0], [1], [0, 0, 1, 1], [], []>} : vector<16x32xf32>, vector<32x64xf32>, vector<16x64xf32> -> vector<16x64xf32>
    %c1_182 = arith.constant 1 : index
    %c0_183 = arith.constant 0 : index
    %c0_184 = arith.constant 0 : index
    %503 = vector.load %arg14[%c1_182, %c0_183, %c0_184] : memref<2x1x64xf32, #tpu.memory_space<vmem>>, vector<1x1x64xf32>
    %504 = vector.shape_cast %503 : vector<1x1x64xf32> to vector<1x64xf32>
    %505 = vector.broadcast %504 : vector<1x64xf32> to vector<16x64xf32>
    %506 = arith.addf %502, %505 : vector<16x64xf32>
    %507 = arith.mulf %506, %506 : vector<16x64xf32>
    %508 = arith.mulf %506, %507 : vector<16x64xf32>
    %cst_185 = arith.constant 4.471500e-02 : f32
    %509 = vector.broadcast %cst_185 : f32 to vector<16x64xf32>
    %510 = arith.mulf %509, %508 : vector<16x64xf32>
    %511 = arith.addf %506, %510 : vector<16x64xf32>
    %cst_186 = arith.constant 0.797884583 : f32
    %512 = vector.broadcast %cst_186 : f32 to vector<16x64xf32>
    %513 = arith.mulf %512, %511 : vector<16x64xf32>
    %514 = math.tanh %513 : vector<16x64xf32>
    %cst_187 = arith.constant 1.000000e+00 : f32
    %515 = vector.broadcast %cst_187 : f32 to vector<16x64xf32>
    %516 = arith.addf %515, %514 : vector<16x64xf32>
    %cst_188 = arith.constant 5.000000e-01 : f32
    %517 = vector.broadcast %cst_188 : f32 to vector<16x64xf32>
    %518 = arith.mulf %517, %516 : vector<16x64xf32>
    %519 = arith.mulf %506, %518 : vector<16x64xf32>
    %c1_189 = arith.constant 1 : index
    %c0_190 = arith.constant 0 : index
    %c0_191 = arith.constant 0 : index
    %520 = vector.load %arg15[%c1_189, %c0_190, %c0_191] : memref<2x64x32xf32, #tpu.memory_space<vmem>>, vector<1x64x32xf32>
    %521 = vector.shape_cast %520 : vector<1x64x32xf32> to vector<64x32xf32>
    %cst_192 = arith.constant dense<0.000000e+00> : vector<16x32xf32>
    %522 = tpu.matmul %519, %521, %cst_192 {dimension_numbers = #tpu.dot_dimension_numbers<[1], [0], [0], [1], [0, 0, 1, 1], [], []>} : vector<16x64xf32>, vector<64x32xf32>, vector<16x32xf32> -> vector<16x32xf32>
    %c1_193 = arith.constant 1 : index
    %c0_194 = arith.constant 0 : index
    %c0_195 = arith.constant 0 : index
    %523 = vector.load %arg16[%c1_193, %c0_194, %c0_195] : memref<2x1x32xf32, #tpu.memory_space<vmem>>, vector<1x1x32xf32>
    %524 = vector.shape_cast %523 : vector<1x1x32xf32> to vector<1x32xf32>
    %525 = vector.broadcast %524 : vector<1x32xf32> to vector<16x32xf32>
    %526 = arith.addf %522, %525 : vector<16x32xf32>
    %527 = arith.addf %526, %499 : vector<16x32xf32>
    %c1_196 = arith.constant 1 : index
    %c0_197 = arith.constant 0 : index
    %c0_198 = arith.constant 0 : index
    %528 = vector.load %arg17[%c1_196, %c0_197, %c0_198] : memref<2x1x32xf32, #tpu.memory_space<vmem>>, vector<1x1x32xf32>
    %529 = vector.shape_cast %528 : vector<1x1x32xf32> to vector<1x32xf32>
    %c1_199 = arith.constant 1 : index
    %c0_200 = arith.constant 0 : index
    %c0_201 = arith.constant 0 : index
    %530 = vector.load %arg18[%c1_199, %c0_200, %c0_201] : memref<2x1x32xf32, #tpu.memory_space<vmem>>, vector<1x1x32xf32>
    %531 = vector.shape_cast %530 : vector<1x1x32xf32> to vector<1x32xf32>
    %cst_202 = arith.constant dense<0.000000e+00> : vector<16xf32>
    %532 = vector.multi_reduction <add>, %527, %cst_202 [1] : vector<16x32xf32> to vector<16xf32>
    %533 = vector.shape_cast %532 : vector<16xf32> to vector<16x1xf32>
    %cst_203 = arith.constant 3.200000e+01 : f32
    %534 = vector.broadcast %cst_203 : f32 to vector<16x1xf32>
    %535 = arith.divf %533, %534 : vector<16x1xf32>
    %536 = vector.broadcast %535 : vector<16x1xf32> to vector<16x32xf32>
    %537 = arith.subf %527, %536 : vector<16x32xf32>
    %538 = arith.mulf %537, %537 : vector<16x32xf32>
    %cst_204 = arith.constant dense<0.000000e+00> : vector<16xf32>
    %539 = vector.multi_reduction <add>, %538, %cst_204 [1] : vector<16x32xf32> to vector<16xf32>
    %540 = vector.shape_cast %539 : vector<16xf32> to vector<16x1xf32>
    %cst_205 = arith.constant 3.200000e+01 : f32
    %541 = vector.broadcast %cst_205 : f32 to vector<16x1xf32>
    %542 = arith.divf %540, %541 : vector<16x1xf32>
    %543 = vector.broadcast %535 : vector<16x1xf32> to vector<16x32xf32>
    %544 = arith.subf %527, %543 : vector<16x32xf32>
    %cst_206 = arith.constant 9.99999996E-13 : f32
    %545 = vector.broadcast %cst_206 : f32 to vector<16x1xf32>
    %546 = arith.addf %542, %545 : vector<16x1xf32>
    %547 = math.rsqrt %546 : vector<16x1xf32>
    %548 = vector.broadcast %547 : vector<16x1xf32> to vector<16x32xf32>
    %549 = arith.mulf %544, %548 : vector<16x32xf32>
    %550 = vector.broadcast %529 : vector<1x32xf32> to vector<16x32xf32>
    %551 = arith.mulf %549, %550 : vector<16x32xf32>
    %552 = vector.broadcast %531 : vector<1x32xf32> to vector<16x32xf32>
    %553 = arith.addf %551, %552 : vector<16x32xf32>
    %554 = vector.extract_strided_slice %553 {offsets = [0, 0], sizes = [1, 32], strides = [1, 1]} : vector<16x32xf32> to vector<1x32xf32>
    %555 = vector.extract_strided_slice %553 {offsets = [8, 0], sizes = [1, 32], strides = [1, 1]} : vector<16x32xf32> to vector<1x32xf32>
    %556 = tpu.concatenate %554, %555 in 0 : vector<1x32xf32>, vector<1x32xf32> -> vector<2x32xf32>
    %c0_207 = arith.constant 0 : index
    %c0_208 = arith.constant 0 : index
    %557 = vector.load %arg19[%c0_207, %c0_208] : memref<32x8xf32, #tpu.memory_space<vmem>>, vector<32x8xf32>
    %cst_209 = arith.constant dense<0.000000e+00> : vector<2x8xf32>
    %558 = tpu.matmul %556, %557, %cst_209 {dimension_numbers = #tpu.dot_dimension_numbers<[1], [0], [0], [1], [0, 0, 1, 1], [], []>} : vector<2x32xf32>, vector<32x8xf32>, vector<2x8xf32> -> vector<2x8xf32>
    %c0_210 = arith.constant 0 : index
    %c0_211 = arith.constant 0 : index
    %559 = vector.load %arg20[%c0_210, %c0_211] : memref<1x8xf32, #tpu.memory_space<vmem>>, vector<1x8xf32>
    %560 = vector.broadcast %559 : vector<1x8xf32> to vector<2x8xf32>
    %561 = arith.addf %558, %560 : vector<2x8xf32>
    %c0_212 = arith.constant 0 : index
    %c0_213 = arith.constant 0 : index
    %562 = vector.load %arg21[%c0_212, %c0_213] : memref<2x8xf32, #tpu.memory_space<vmem>>, vector<2x8xf32>
    tpu.vector_store %arg21[%c0_212, %c0_213], %561 {strides = array<i32>} : memref<2x8xf32, #tpu.memory_space<vmem>>, vector<2x8xf32>,
    return
  }
}

</mosaic_0001>

<bundles_post_ra>
// kernel: squeeze.0
= control target key start
LH: loop header
LB: loop body
LE: loop exit
PB: predicated region body
PF: predicated region fallthrough
CT: control target
= control target key end

     0   :  { %s66_s8 = smov 125   ;;  %s67_s9 = smov 123   ;;  %vm7_vm0 = vcmask 7168   ;;  %s117_s0 = inlined_call_operand.vmem [shape: s32[2,8], index: 0, kind: input, shape index: {}]   ;;  %s118_s1 = inlined_call_operand.vmem [shape: s32[16,1], index: 1, kind: output, shape index: {}]  }
   0x1   :  { %v4_v0 = vld [vmem:[%s117_s0] sm:$0x3]  ;;  %s65_s0 = smov 127   ;;  %s68_s10 = smov 126  }
   0x2   :  { %5 = vst [vmem:[#allocation0] sm:$0x3] %v4_v0  ;;  %s69_s11 = smov 124   ;;  %s70_s12 = smov 122  }
   0x3   :  { %s71_s13 = smov 121  }
   0x9   :  { %v9_v1 = vld [vmem:[#allocation0] sm:$0x3]  }
   0xa   :  { %v21_v2 = vld [vmem:[#allocation0] sm:$0x3]   ;;  %10 = vrot.lane.b32.xlu0 %v9_v1, %s65_s0 }
   0xb   :  { %22 = vrot.lane.b32.xlu1 %v21_v2, %s66_s8  ;;  %v33_v3 = vld [vmem:[#allocation0] sm:$0x3]  }
   0xc   :  { %34 = vrot.lane.b32.xlu2 %v33_v3, %s67_s9  ;;  %v15_v4 = vld [vmem:[#allocation0] sm:$0x3]  }
   0xd   :  { %v27_v5 = vld [vmem:[#allocation0] sm:$0x3]  }
   0xe   :  { %v39_v6 = vld [vmem:[#allocation0] sm:$0x3]  }
   0xf   :  { %v45_v7 = vld [vmem:[#allocation0] sm:$0x3]  }
  0x10   :  { %v6_v8 = vld [vmem:[#allocation0] sm:$0x3]  }
  0x11   :  { %8 = vst.msk [vmem:[%s118_s1] ss:$8 sm:$0x3] %vm7_vm0, %v6_v8  }
  0x12   :  { %16 = vrot.lane.b32.xlu0 %v15_v4, %s68_s10 }
  0x13   :  { %28 = vrot.lane.b32.xlu1 %v27_v5, %s69_s11 }
  0x14   :  { %40 = vrot.lane.b32.xlu2 %v39_v6, %s70_s12 }
  0x1a   :  { %46 = vrot.lane.b32.xlu0 %v45_v7, %s71_s13 }
  0x66   :  { %v35_v9 = vpop.permute.xlu2 %34  }
  0x67   :  { %55 = vst.msk [vmem:[%s118_s1 + $0x5] ss:$8 sm:$0x3] %vm7_vm0, %v35_v9  }
  0x6e   :  { %v41_v10 = vpop.permute.xlu2 %40  }
  0x6f   :  { %56 = vst.msk [vmem:[%s118_s1 + $0x6] ss:$8 sm:$0x3] %vm7_vm0, %v41_v10  }
  0x7c   :  { %v11_v11 = vpop.permute.xlu0 %10  }
  0x7d   :  { %v23_v12 = vpop.permute.xlu1 %22   ;;  %51 = vst.msk [vmem:[%s118_s1 + $0x1] ss:$8 sm:$0x3] %vm7_vm0, %v11_v11  }
  0x7e   :  { %53 = vst.msk [vmem:[%s118_s1 + $0x3] ss:$8 sm:$0x3] %vm7_vm0, %v23_v12  }
  0x84   :  { %v17_v13 = vpop.permute.xlu0 %16  }
  0x85   :  { %v29_v14 = vpop.permute.xlu1 %28   ;;  %52 = vst.msk [vmem:[%s118_s1 + $0x2] ss:$8 sm:$0x3] %vm7_vm0, %v17_v13  }
  0x86   :  { %54 = vst.msk [vmem:[%s118_s1 + $0x4] ss:$8 sm:$0x3] %vm7_vm0, %v29_v14  }
  0x8c   :  { %v47_v15 = vpop.permute.xlu0 %46  }
  0x8d   :  { %57 = vst.msk [vmem:[%s118_s1 + $0x7] ss:$8 sm:$0x3] %vm7_vm0, %v47_v15  }

// kernel: bert_module_forward.1
= control target key start
LH: loop header
LB: loop body
LE: loop exit
PB: predicated region body
PF: predicated region fallthrough
CT: control target
= control target key end

     0   :  { %s2981_s0 = inlined_call_operand.vmem [shape: s32[16,1], index: 0, kind: input, shape index: {}]   ;;  %s2982_s1 = inlined_call_operand.vmem [shape: s32[2,8], index: 1, kind: input, shape index: {}]   ;;  %s2983_s2 = inlined_call_operand.vmem [shape: f32[96,32], index: 2, kind: input, shape index: {}]   ;;  %s2984_s3 = inlined_call_operand.vmem [shape: f32[8,32], index: 3, kind: input, shape index: {}]   ;;  %s2985_s4 = inlined_call_operand.vmem [shape: f32[1,32], index: 4, kind: input, shape index: {}]   ;;  %s2986_s5 = inlined_call_operand.vmem [shape: f32[1,32], index: 5, kind: input, shape index: {}]   ;;  %s2987_s6 = inlined_call_operand.vmem [shape: f32[1,32], index: 6, kind: input, shape index: {}]   ;;  %s2988_s7 = inlined_call_operand.vmem [shape: f32[2,32,96], index: 7, kind: input, shape index: {}]   ;;  %s2989_s8 = inlined_call_operand.vmem [shape: f32[2,1,96], index: 8, kind: input, shape index: {}]   ;;  %s2990_s9 = inlined_call_operand.vmem [shape: f32[2,32,32], index: 9, kind: input, shape index: {}]   ;;  %s2991_s10 = inlined_call_operand.vmem [shape: f32[2,1,32], index: 10, kind: input, shape index: {}]   ;;  %s2992_s11 = inlined_call_operand.vmem [shape: f32[2,1,32], index: 11, kind: input, shape index: {}]   ;;  %s2993_s12 = inlined_call_operand.vmem [shape: f32[2,1,32], index: 12, kind: input, shape index: {}]   ;;  %s2994_s13 = inlined_call_operand.vmem [shape: f32[2,32,64], index: 13, kind: input, shape index: {}]   ;;  %s2995_s14 = inlined_call_operand.vmem [shape: f32[2,1,64], index: 14, kind: input, shape index: {}]   ;;  %s2996_s15 = inlined_call_operand.vmem [shape: f32[2,64,32], index: 15, kind: input, shape index: {}]   ;;  %s2997_s16 = inlined_call_operand.vmem [shape: f32[2,1,32], index: 16, kind: input, shape index: {}]   ;;  %s2998_s17 = inlined_call_operand.vmem [shape: f32[2,1,32], index: 17, kind: input, shape index: {}]   ;;  %s2999_s18 = inlined_call_operand.vmem [shape: f32[2,1,32], index: 18, kind: input, shape index: {}]   ;;  %s3000_s19 = inlined_call_operand.vmem [shape: f32[32,8], index: 19, kind: input, shape index: {}]   ;;  %s3001_s20 = inlined_call_operand.vmem [shape: f32[1,8], index: 20, kind: input, shape index: {}]   ;;  %s3002_s21 = inlined_call_operand.hbm [shape: f32[2,8], index: 21, kind: output, shape index: {}]  }
   0x1   :  { %3020 = sst [smem:[#allocation5_spill]] %s2981_s0 }
   0x2   :  { %3021 = sst [smem:[#allocation6_spill]] %s2982_s1 }
   0x3   :  { %3022 = sst [smem:[#allocation7_spill]] %s2983_s2 }
   0x4   :  { %3023 = sst [smem:[#allocation8_spill]] %s2984_s3 }
   0x5   :  { %3024 = sst [smem:[#allocation9_spill]] %s2985_s4 }
   0x6   :  { %3025 = sst [smem:[#allocation10_spill]] %s2986_s5 }
   0x7   :  { %3026 = sst [smem:[#allocation11_spill]] %s2997_s16 }
   0x8   :  { %s3027_s26 = sld [smem:[#allocation5_spill]]  ;;  %v2231_v3 = vmov 0  }
   0x9   :  { %s3028_s16 = sld [smem:[#allocation7_spill]]  ;;  %2089 = vset.pattern.permute.xlu0 %v2231_v3  ;;  %2090 = vset.pattern.permute.xlu1 %v2231_v3 }
   0xe   :  { %v69_v0 = vld [vmem:[%s3027_s26] sm:$0xff] }
   0xf   :  { %v96_v1 = vld [vmem:[%s3028_s16 + $0x58] sm:$0xff]  ;;  %v95_v2 = vld [vmem:[%s3028_s16 + $0x50] sm:$0xff]  ;;  %74 = vperm.xlu0 %2089, %v69_v0   ;;  %v94_v4 = vld [vmem:[%s3028_s16 + $0x48] sm:$0xff] }
  0x10   :  { %109 = vmatpush.msra.mxu0 %v96_v1  ;;  %v93_v5 = vld [vmem:[%s3028_s16 + $0x40] sm:$0xff]  ;;  %v92_v6 = vld [vmem:[%s3028_s16 + $0x38] sm:$0xff]  ;;  %v91_v7 = vld [vmem:[%s3028_s16 + $0x30] sm:$0xff] }
  0x11   :  { %v90_v8 = vld [vmem:[%s3028_s16 + $0x28] sm:$0xff] }
  0x12   :  { %110 = vmatpush.msra.mxu0 %v95_v2 }
  0x14   :  { %111 = vmatpush.msra.mxu0 %v94_v4 }
  0x16   :  { %112 = vmatpush.msra.mxu0 %v93_v5 }
  0x18   :  { %113 = vmatpush.msra.mxu0 %v92_v6 }
  0x19   :  { %26 = vsyncpa [#allocation3], 0  ;;  %v89_v9 = vld [vmem:[%s3028_s16 + $0x20] sm:$0xff]  ;;  %v88_v10 = vld [vmem:[%s3028_s16 + $0x18] sm:$0xff]  ;;  %v71_v14 = vlaneseq  ;;  %vm98_vm0 = vcmask 785408   ;;  %v2232_v17 = vmov 0.0  }
  0x1a   :  { %114 = vmatpush.msra.mxu0 %v91_v7  ;;  %v87_v11 = vld [vmem:[%s3028_s16 + $0x10] sm:$0xff]  ;;  %v86_v12 = vld [vmem:[%s3028_s16 + $0x8] sm:$0xff]  ;;  %v85_v13 = vld [vmem:[%s3028_s16] sm:$0xff]  ;;  %s3029_s2 = sld [smem:[#allocation8_spill]]  ;;  %vm136_vm2 = vcmask 261120   ;;  %v2233_v25 = vmov 32.0  }
  0x1b   :  { %v72_v15 = vand.u32 127, %v71_v14  ;;  %s3030_s3 = sld [smem:[#allocation9_spill]]  ;;  %2111 = vrcp.f32 %v2233_v25  ;;  %v70_v37 = vld [vmem:[%s3027_s26 + $0x8] sm:$0xff]  ;;  %v205_v38 = vld [vmem:[%s2988_s7 + $0x18] sm:$0xff]  ;;  %v204_v39 = vld [vmem:[%s2988_s7 + $0x10] sm:$0xff]  ;;  %s2235_s28 = smov 96  }
  0x1c   :  { %115 = vmatpush.msra.mxu0 %v90_v8  ;;  %228 = vmatpush.msra.mxu1 %v205_v38  ;;  %v203_v40 = vld [vmem:[%s2988_s7 + $0x8] sm:$0xff]  ;;  %v202_v41 = vld [vmem:[%s2988_s7] sm:$0xff]  ;;  %s2236_s29 = smov 80   ;;  %vm242_vm8 = vcmask 64512   ;;  %s2237_s0 = smov 64   ;;  %vm521_vm12 = vcmask 130048  }
  0x1d   :  { %v2440_v54 = vld [vmem:[%s2987_s6] ss:$0 sm:$0xff]  ;;  %s3008_s6 = smov 88   ;;  %s2238_s4 = smov 72   ;;  %vm523_vm13 = vcmask 195584  }
  0x1e   :  { %116 = vmatpush.msra.mxu0 %v89_v9  ;;  %229 = vmatpush.msra.mxu1 %v204_v39  ;;  %v2452_v59 = vld [vmem:[%s2989_s8] ss:$0 sm:$0xff]  ;;  %s3032_s22 = sld [smem:[#allocation6_spill]]  ;;  %s3010_s23 = smov 104  }
  0x1f   :  { %s2240_s1 = smov 120   ;;  %s2241_s26 = smov 48  }
  0x20   :  { %117 = vmatpush.msra.mxu0 %v88_v10  ;;  %v2402_v19 = vld [vmem:[%s3029_s2] sm:$0xff]  ;;  %230 = vmatpush.msra.mxu1 %v203_v40  ;;  %s3031_s2 = sld [smem:[#allocation10_spill]]  ;;  %s3006_s24 = smov 112  }
  0x21   :  { %v2407_v20 = vld [vmem:[%s3030_s3] ss:$0 sm:$0xff]  ;;  %v2112_v26 = vpop.eup %2111  ;;  %s2244_s25 = smov 40   ;;  %s3016_s27 = smov 24  }
  0x22   :  { %118 = vmatpush.msra.mxu0 %v87_v11  ;;  %v144_v27 = vmul.f32 32.0, %v2112_v26  ;;  %vm148_vm3 = vweird.f32 %v2112_v26  ;;  %231 = vmatpush.msra.mxu1 %v202_v41  ;;  %s3012_s3 = smov 8   ;;  %s3018_s16 = smov 16  }
  0x23   :  { %s3033_s30 = sld [smem:[#allocation11_spill]] }
  0x24   :  { %119 = vmatpush.msra.mxu0 %v86_v12  ;;  %v145_v28 = vsub.f32 1.0, %v144_v27  ;;  %v198_v8 = vld [vmem:[%s3032_s22] sm:$0x3]  ;;  %s3035_s22 = smov 88  }
  0x25   :  { %v199_v9 = vcvt.s32.f32 %v198_v8 }
  0x26   :  { %120 = vmatpush.msra.mxu0 %v85_v13  ;;  %v146_v29 = vmul.f32 %v2112_v26, %v145_v28  ;;  %v2435_v51 = vld [vmem:[%s3031_s2] ss:$0 sm:$0xff]  ;;  %s3014_s2 = smov 56  }
  0x27   :  { %v200_v10 = vsub.f32 1.0, %v199_v9 }
  0x28   :  { %v147_v30 = vadd.f32 %v2112_v26, %v146_v29 }
  0x29   :  { %v2480_v11 = vmul.f32 -1e+09, %v200_v10 }
  0x2a   :  { %v2412_v31 = vsel %vm148_vm3, %v2112_v26, %v147_v30 }
  0x2b   :  { %v2483_v12 = vperm.slane %v2480_v11, 0 }
  0x81   :  { %v75_v16 = vpop.permute.xlu0 %74 }
  0x82   :  { %vm79_vm1 = vcmp.eq.s32.totalorder %v72_v15, %v75_v16 }
  0x83   :  { %v1974_v18 = vsel %vm79_vm1, 1.0, %v2232_v17  ;;  %vm970_vm1 = vcmask 523264  }
  0x84   :  { %1976 = vmatmul.msk.f32.vlgmr.msra.gmra.mxu0 %vm98_vm0, %v1974_v18 }
 0x101   :  { %v122_v21 = vpop.f32.mrf.mxu0 }
 0x102   :  { %v123_v22 = vadd.f32 %v122_v21, %v2402_v19 }
 0x104   :  { %v132_v23 = vadd.f32 %v2407_v20, %v123_v22 }
 0x106   :  { %v137_v24 = vsel %vm136_vm2, %v132_v23, 0.0 }
 0x107   :  { %138 = vadd.xlane.f32.xlu0 %v137_v24 }
 0x17a   :  { %v139_v32 = vpop.xlane.xlu0 %138 }
 0x17b   :  { %v150_v33 = vmul.f32 %v2412_v31, %v139_v32 }
 0x17d   :  { %v152_v34 = vsub.f32 %v132_v23, %v150_v33 }
 0x17f   :  { %v154_v35 = vmul.f32 %v152_v34, %v152_v34 }
 0x181   :  { %v156_v36 = vsel %vm136_vm2, %v154_v35, 0.0 }
 0x182   :  { %157 = vadd.xlane.f32.xlu1 %v156_v36 }
 0x19b   :  { %77 = vperm.xlu1 %2090, %v70_v37  }
 0x1f5   :  { %v158_v42 = vpop.xlane.xlu1 %157 }
 0x1f6   :  { %v162_v43 = vmul.f32 %v158_v42, %v2412_v31 }
 0x1f8   :  { %v164_v44 = vadd.f32 1e-12, %v162_v43 }
 0x1fa   :  { %2113 = vrsqrt.f32 %v164_v44  ;;  %vm172_vm5 = vweird.f32 %v164_v44 }
 0x200   :  { %v2114_v45 = vpop.eup %2113 }
 0x201   :  { %v167_v46 = vmul.f32 %v2114_v45, %v164_v44  ;;  %vm173_vm4 = vweird.f32 %v2114_v45 }
 0x202   :  { %vm174_vm6 = vmor %vm172_vm5, %vm173_vm4 }
 0x203   :  { %v168_v47 = vmul.f32 %v2114_v45, %v167_v46 }
 0x205   :  { %v169_v48 = vmul.f32 0.5, %v168_v47 }
 0x207   :  { %v170_v49 = vsub.f32 1.5, %v169_v48 }
 0x209   :  { %v171_v50 = vmul.f32 %v2114_v45, %v170_v49 }
 0x20b   :  { %v175_v52 = vsel %vm174_vm6, %v2114_v45, %v171_v50 }
 0x20c   :  { %v186_v53 = vmul.f32 %v175_v52, %v152_v34 }
 0x20d   :  { %v78_v55 = vpop.permute.xlu1 %77 }
 0x20e   :  { %v191_v56 = vmul.f32 %v2435_v51, %v186_v53  ;;  %vm80_vm7 = vcmp.eq.s32.totalorder %v72_v15, %v78_v55 }
 0x20f   :  { %v1975_v57 = vsel %vm80_vm7, 1.0, %v2232_v17 }
 0x210   :  { %v2444_v58 = vadd.f32 %v2440_v54, %v191_v56  ;;  %1977 = vmatmul.msk.f32.gmra.mxu0 %vm98_vm0, %v1975_v57 }
 0x212   :  { %1978 = vmatmul.msk.f32.vlgmr.msra.gmra.mxu1 %vm136_vm2, %v2444_v58 }
 0x28d   :  { %v125_v62 = vpop.f32.mrf.mxu0 }
 0x28e   :  { %v126_v63 = vadd.f32 %v125_v62, %v2402_v19 }
 0x28f   :  { %v233_v60 = vpop.f32.mrf.mxu1 }
 0x290   :  { %v2455_v61 = vadd.f32 %v2452_v59, %v233_v60  ;;  %v133_v0 = vadd.f32 %v2407_v20, %v126_v63 }
 0x292   :  { %309 = vrot.lane.b32.xlu0 %v2455_v61, %s3008_s6  ;;  %240 = vrot.lane.b32.xlu2 %v2455_v61, %s2235_s28  ;;  %v140_v1 = vsel %vm136_vm2, %v133_v0, 0.0 }
 0x29a   :  { %376 = vrot.lane.b32.xlu0 %v2455_v61, %s2236_s29 }
 0x2bb   :  { %141 = vadd.xlane.f32.xlu2 %v140_v1 }
 0x2ec   :  { %v241_v2 = vpop.permute.xlu2 %240 }
 0x2ed   :  { %1980 = vmatpush.xpose.msk.msrb.mxu0 %vm242_vm8, %v241_v2 }
 0x2f0   :  { %1981 = vmatmul.msk.f32.vlgmr.msrb.gmra.mxu0 %vm242_vm8, %v2455_v61 }
 0x304   :  { %v310_v21 = vpop.permute.xlu0 %309 }
 0x30c   :  { %v377_v46 = vpop.permute.xlu0 %376 }
 0x32e   :  { %v142_v3 = vpop.xlane.xlu2 %141 }
 0x32f   :  { %v151_v4 = vmul.f32 %v2412_v31, %v142_v3 }
 0x331   :  { %v153_v5 = vsub.f32 %v133_v0, %v151_v4 }
 0x333   :  { %v155_v6 = vmul.f32 %v153_v5, %v153_v5 }
 0x335   :  { %v159_v7 = vsel %vm136_vm2, %v155_v6, 0.0 }
 0x336   :  { %160 = vadd.xlane.f32.xlu2 %v159_v7 }
 0x34e   :  { %281 = vrot.lane.b32.xlu2 %v2455_v61, %s2237_s0 }
 0x356   :  { %443 = vrot.lane.b32.xlu2 %v2455_v61, %s2238_s4 }
 0x35e   :  { %441 = vrot.lane.b32.xlu2 %v2455_v61, %s3010_s23 }
 0x36d   :  { %v264_v13 = vpop.f32.mrf.mxu0 }
 0x36e   :  { %v267_v14 = vmul.f32 0.35355338, %v264_v13 }
 0x370   :  { %v269_v15 = vadd.f32 %v2483_v12, %v267_v14 }
 0x372   :  { %v270_v16 = vsel %vm242_vm8, %v269_v15, -inf }
 0x373   :  { %271 = vmax.xlane.f32.xlu1 %v270_v16 }
 0x38c   :  { %307 = vrot.lane.b32.xlu1 %v2455_v61, %s2240_s1 }
 0x394   :  { %415 = vrot.lane.b32.xlu1 %v2455_v61, %s2241_s26 }
 0x3a9   :  { %v161_v17 = vpop.xlane.xlu2 %160 }
 0x3aa   :  { %v163_v18 = vmul.f32 %v161_v17, %v2412_v31 }
 0x3ac   :  { %v165_v19 = vadd.f32 1e-12, %v163_v18 }
 0x3ae   :  { %2115 = vrsqrt.f32 %v165_v19  ;;  %vm182_vm9 = vweird.f32 %v165_v19 }
 0x3b1   :  { %v282_v20 = vpop.permute.xlu2 %281 }
 0x3b2   :  { %302 = vmatpush.msra.mxu3 %v282_v20 }
 0x3b4   :  { %1983 = vmatpush.xpose.msk.msrb.mxu3 %vm242_vm8, %v310_v21  ;;  %v2116_v22 = vpop.eup %2115 }
 0x3b5   :  { %v177_v23 = vmul.f32 %v2116_v22, %v165_v19  ;;  %vm183_vm10 = vweird.f32 %v2116_v22 }
 0x3b6   :  { %vm184_vm11 = vmor %vm182_vm9, %vm183_vm10 }
 0x3b7   :  { %v178_v24 = vmul.f32 %v2116_v22, %v177_v23 }
 0x3b9   :  { %v179_v25 = vmul.f32 0.5, %v178_v24  ;;  %v444_v26 = vpop.permute.xlu2 %443 }
 0x3ba   :  { %1989 = vmatpush.xpose.msk.msrb.mxu1 %vm242_vm8, %v444_v26  ;;  %v2547_v26 = vperm.slane %v2480_v11, 1 }
 0x3bb   :  { %v180_v27 = vsub.f32 1.5, %v179_v25 }
 0x3bd   :  { %v181_v28 = vmul.f32 %v2116_v22, %v180_v27 }
 0x3bf   :  { %v185_v29 = vsel %vm184_vm11, %v2116_v22, %v181_v28 }
 0x3c0   :  { %v187_v30 = vmul.f32 %v185_v29, %v153_v5 }
 0x3c1   :  { %v442_v34 = vpop.permute.xlu2 %441 }
 0x3c2   :  { %v192_v32 = vmul.f32 %v2435_v51, %v187_v30 }
 0x3c4   :  { %v2496_v33 = vadd.f32 %v2440_v54, %v192_v32 }
 0x3c6   :  { %1979 = vmatmul.msk.f32.gmra.mxu1 %vm136_vm2, %v2496_v33 }
 0x3ce   :  { %1990 = vmatmul.msk.f32.vlgmr.msrb.gmra.mxu1 %vm242_vm8, %v442_v34 }
 0x3e6   :  { %v272_v35 = vpop.xlane.xlu1 %271 }
 0x3e7   :  { %v273_v36 = vsub.f32 %v269_v15, %v272_v35 }
 0x3e9   :  { %v274_v37 = vmul.f32 1.442695, %v273_v36 }
 0x3eb   :  { %2117 = vpow2.f32 %v274_v37 }
 0x3f1   :  { %v2118_v38 = vpop.eup %2117 }
 0x3f2   :  { %v276_v39 = vsel %vm242_vm8, %v2118_v38, 0.0 }
 0x3f3   :  { %277 = vadd.xlane.f32.xlu0 %v276_v39 }
 0x3fe   :  { %v308_v50 = vpop.permute.xlu1 %307 }
 0x406   :  { %v416_v53 = vpop.permute.xlu1 %415 }
 0x407   :  { %374 = vrot.lane.b32.xlu0 %v2455_v61, %s3006_s24 }
 0x40f   :  { %348 = vrot.lane.b32.xlu0 %v2455_v61, %s3014_s2 }
 0x443   :  { %v236_v40 = vpop.f32.mrf.mxu1 }
 0x444   :  { %v2507_v41 = vadd.f32 %v2452_v59, %v236_v40 }
 0x446   :  { %594 = vrot.lane.b32.xlu0 %v2507_v41, %s3008_s6  ;;  %s1965_s6 = sshll.u32 %s3002_s21, 4  ;;  %s1966_s6 = int_to_ptr.hbm [resolvable:$true] %s1965_s6 }
 0x44b   :  { %v466_v42 = vpop.f32.mrf.mxu1 }
 0x44c   :  { %v469_v43 = vmul.f32 0.35355338, %v466_v42 }
 0x44e   :  { %v470_v44 = vadd.f32 %v469_v43, %v2483_v12 }
 0x450   :  { %v471_v45 = vsel %vm242_vm8, %v470_v44, -inf }
 0x451   :  { %472 = vmax.xlane.f32.xlu2 %v471_v45 }
 0x466   :  { %v278_v47 = vpop.xlane.xlu0 %277 }
 0x467   :  { %2119 = vrcp.f32 %v278_v47 }
 0x469   :  { %482 = vrot.lane.b32.xlu2 %v2455_v61, %s2244_s25 }
 0x46d   :  { %v2120_v48 = vpop.eup %2119 }
 0x46e   :  { %v280_v49 = vmul.f32 %v2120_v48, %v2118_v38 }
 0x470   :  { %1982 = vmatmul.msk.f32.vlgmr.msra.gmra.mxu3 %vm242_vm8, %v280_v49 }
 0x471   :  { %1986 = vmatpush.xpose.msk.msra.mxu3 %vm242_vm8, %v377_v46  ;;  %592 = vrot.lane.b32.xlu2 %v2507_v41, %s2240_s1 }
 0x478   :  { %1984 = vmatmul.msk.f32.vlgmr.msrb.gmra.mxu3 %vm242_vm8, %v308_v50 }
 0x479   :  { %v375_v51 = vpop.permute.xlu0 %374 }
 0x480   :  { %1987 = vmatmul.msk.f32.vlgmr.msra.gmra.mxu3 %vm242_vm8, %v375_v51 }
 0x481   :  { %v349_v52 = vpop.permute.xlu0 %348 }
 0x482   :  { %369 = vmatpush.msra.mxu2 %v349_v52 }
 0x484   :  { %436 = vmatpush.msrb.mxu2 %v416_v53 }
 0x4b8   :  { %v595_v59 = vpop.permute.xlu0 %594 }
 0x4c4   :  { %v473_v54 = vpop.xlane.xlu2 %472 }
 0x4c5   :  { %v474_v55 = vsub.f32 %v470_v44, %v473_v54 }
 0x4c7   :  { %v475_v56 = vmul.f32 1.442695, %v474_v55 }
 0x4c9   :  { %2121 = vpow2.f32 %v475_v56 }
 0x4cc   :  { %v483_v57 = vpop.permute.xlu2 %482 }
 0x4cd   :  { %503 = vmatpush.msrb.mxu3 %v483_v57 }
 0x4cf   :  { %1995 = vmatpush.xpose.msk.msra.mxu3 %vm242_vm8, %v595_v59  ;;  %v2122_v60 = vpop.eup %2121 }
 0x4d0   :  { %v477_v61 = vsel %vm242_vm8, %v2122_v60, 0.0 }
 0x4d1   :  { %478 = vadd.xlane.f32.xlu2 %v477_v61 }
 0x4d4   :  { %v593_v7 = vpop.permute.xlu2 %592 }
 0x4e9   :  { %726 = vrot.lane.b32.xlu2 %v2507_v41, %s3010_s23 }
 0x4f3   :  { %v2525_v62 = vpop.f32.mrf.mxu3 }
 0x4fb   :  { %v332_v63 = vpop.f32.mrf.mxu3 }
 0x4fc   :  { %v335_v0 = vmul.f32 0.35355338, %v332_v63 }
 0x4fe   :  { %v336_v1 = vadd.f32 %v335_v0, %v2483_v12 }
 0x500   :  { %v337_v2 = vsel %vm242_vm8, %v336_v1, -inf }
 0x501   :  { %338 = vmax.xlane.f32.xlu0 %v337_v2 }
 0x503   :  { %v399_v3 = vpop.f32.mrf.mxu3 }
 0x504   :  { %v402_v4 = vmul.f32 0.35355338, %v399_v3 }
 0x506   :  { %v403_v5 = vadd.f32 %v402_v4, %v2483_v12 }
 0x508   :  { %v404_v6 = vsel %vm242_vm8, %v403_v5, -inf }
 0x509   :  { %405 = vmax.xlane.f32.xlu1 %v404_v6  ;;  %v810_v6 = vld [vmem:[%s2990_s9 + $0x10] sm:$0xff] }
 0x515   :  { %526 = vrot.lane.b32.xlu0 %v2507_v41, %s2235_s28 }
 0x522   :  { %728 = vrot.lane.b32.xlu1 %v2507_v41, %s2238_s4 }
 0x544   :  { %v479_v8 = vpop.xlane.xlu2 %478 }
 0x545   :  { %2123 = vrcp.f32 %v479_v8  ;;  %v808_v8 = vld [vmem:[%s2990_s9] sm:$0xff] }
 0x54b   :  { %v2124_v9 = vpop.eup %2123 }
 0x54c   :  { %v481_v10 = vmul.f32 %v2124_v9, %v2122_v60  ;;  %v727_v24 = vpop.permute.xlu2 %726 }
 0x54e   :  { %1991 = vmatmul.msk.f32.vlgmr.msrb.gmra.mxu3 %vm242_vm8, %v481_v10 }
 0x556   :  { %1996 = vmatmul.msk.f32.vlgmr.msra.gmra.mxu3 %vm242_vm8, %v593_v7  ;;  %v809_v7 = vld [vmem:[%s2990_s9 + $0x8] sm:$0xff] }
 0x574   :  { %v339_v13 = vpop.xlane.xlu0 %338 }
 0x575   :  { %v340_v14 = vsub.f32 %v336_v1, %v339_v13 }
 0x577   :  { %v341_v15 = vmul.f32 1.442695, %v340_v14 }
 0x579   :  { %2125 = vpow2.f32 %v341_v15 }
 0x57c   :  { %v406_v16 = vpop.xlane.xlu1 %405 }
 0x57d   :  { %v407_v17 = vsub.f32 %v403_v5, %v406_v16  ;;  %v811_v5 = vld [vmem:[%s2990_s9 + $0x18] sm:$0xff] }
 0x57f   :  { %v2126_v18 = vpop.eup %2125  ;;  %v408_v19 = vmul.f32 1.442695, %v407_v17 }
 0x580   :  { %v343_v20 = vsel %vm242_vm8, %v2126_v18, 0.0 }
 0x581   :  { %2127 = vpow2.f32 %v408_v19  ;;  %344 = vadd.xlane.f32.xlu0 %v343_v20 }
 0x587   :  { %v2128_v21 = vpop.eup %2127  ;;  %v527_v32 = vpop.permute.xlu0 %526 }
 0x588   :  { %v410_v22 = vsel %vm242_vm8, %v2128_v21, 0.0 }
 0x589   :  { %411 = vadd.xlane.f32.xlu1 %v410_v22 }
 0x594   :  { %v729_v23 = vpop.permute.xlu1 %728 }
 0x595   :  { %661 = vrot.lane.b32.xlu0 %v2507_v41, %s2236_s29  ;;  %2001 = vmatpush.xpose.msk.msrb.mxu3 %vm242_vm8, %v729_v23 }
 0x598   :  { %2002 = vmatmul.msk.f32.vlgmr.msrb.gmra.mxu3 %vm242_vm8, %v727_v24 }
 0x5a2   :  { %659 = vrot.lane.b32.xlu1 %v2507_v41, %s3006_s24 }
 0x5d1   :  { %v505_v25 = vpop.f32.mrf.mxu3 }
 0x5d2   :  { %517 = vrot.lane.b32.xlu1 %v505_v25, %s3016_s27 }
 0x5d9   :  { %v617_v27 = vpop.f32.mrf.mxu3 }
 0x5da   :  { %v620_v28 = vmul.f32 0.35355338, %v617_v27 }
 0x5dc   :  { %v621_v29 = vadd.f32 %v620_v28, %v2547_v26 }
 0x5de   :  { %v622_v30 = vsel %vm242_vm8, %v621_v29, -inf }
 0x5df   :  { %623 = vmax.xlane.f32.xlu2 %v622_v30 }
 0x5f4   :  { %v345_v34 = vpop.xlane.xlu0 %344 }
 0x5f5   :  { %2129 = vrcp.f32 %v345_v34 }
 0x5fb   :  { %v2130_v35 = vpop.eup %2129 }
 0x5fc   :  { %v412_v36 = vpop.xlane.xlu1 %411  ;;  %v347_v37 = vmul.f32 %v2130_v35, %v2126_v18  ;;  %v2602_v35 = vld [vmem:[%s2991_s10] ss:$0 sm:$0xff] }
 0x5fd   :  { %2131 = vrcp.f32 %v412_v36 }
 0x5fe   :  { %1985 = vmatmul.msk.f32.vlgmr.msra.gmra.mxu2 %vm242_vm8, %v347_v37 }
 0x5ff   :  { %1992 = vmatpush.xpose.msk.msra.mxu2 %vm242_vm8, %v527_v32 }
 0x603   :  { %v2132_v11 = vpop.eup %2131 }
 0x604   :  { %v414_v38 = vmul.f32 %v2132_v11, %v2128_v21 }
 0x606   :  { %1988 = vmatmul.msk.f32.vlgmr.msrb.gmra.mxu2 %vm242_vm8, %v414_v38 }
 0x607   :  { %v662_v39 = vpop.permute.xlu0 %661 }
 0x608   :  { %1998 = vmatpush.xpose.msk.msra.mxu0 %vm242_vm8, %v662_v39 }
 0x60c   :  { %834 = vmatpush.msrb.mxu0 %v811_v5 }
 0x60e   :  { %1993 = vmatmul.msk.f32.vlgmr.msra.gmra.mxu2 %vm242_vm8, %v2507_v41  ;;  %835 = vmatpush.msrb.mxu0 %v810_v6 }
 0x610   :  { %836 = vmatpush.msrb.mxu0 %v809_v7  ;;  %v2632_v7 = vld [vmem:[%s2992_s11] ss:$0 sm:$0xff] }
 0x612   :  { %837 = vmatpush.msrb.mxu0 %v808_v8 }
 0x614   :  { %v660_v40 = vpop.permute.xlu1 %659 }
 0x615   :  { %1999 = vmatmul.msk.f32.vlgmr.msra.gmra.mxu0 %vm242_vm8, %v660_v40 }
 0x61b   :  { %v751_v42 = vpop.f32.mrf.mxu3 }
 0x61c   :  { %v754_v43 = vmul.f32 0.35355338, %v751_v42 }
 0x61e   :  { %v755_v44 = vadd.f32 %v754_v43, %v2547_v26 }
 0x620   :  { %v756_v45 = vsel %vm242_vm8, %v755_v44, -inf }
 0x621   :  { %757 = vmax.xlane.f32.xlu1 %v756_v45 }
 0x644   :  { %v518_v48 = vpop.permute.xlu1 %517 }
 0x652   :  { %v624_v55 = vpop.xlane.xlu2 %623 }
 0x653   :  { %v625_v57 = vsub.f32 %v621_v29, %v624_v55 }
 0x655   :  { %v626_v61 = vmul.f32 1.442695, %v625_v57  ;;  %v905_v57 = vld [vmem:[%s2994_s13 + $0x10] sm:$0xff] }
 0x681   :  { %v371_v46 = vpop.f32.mrf.mxu2 }
 0x682   :  { %509 = vrot.lane.b32.xlu2 %v371_v46, %s3012_s3 }
 0x689   :  { %v438_v47 = vpop.f32.mrf.mxu2 }
 0x68a   :  { %513 = vrot.lane.b32.xlu0 %v438_v47, %s3018_s16 }
 0x691   :  { %v549_v56 = vpop.f32.mrf.mxu2 }
 0x692   :  { %v684_v50 = vpop.f32.mrf.mxu0  ;;  %v552_v60 = vmul.f32 0.35355338, %v549_v56  ;;  %v906_v56 = vld [vmem:[%s2994_s13 + $0x18] sm:$0xff] }
 0x693   :  { %v687_v52 = vmul.f32 0.35355338, %v684_v50 }
 0x694   :  { %v758_v49 = vpop.xlane.xlu1 %757  ;;  %v554_v0 = vadd.f32 %v2547_v26, %v552_v60  ;;  %v903_v60 = vld [vmem:[%s2994_s13] sm:$0xff] }
 0x695   :  { %v759_v51 = vsub.f32 %v755_v44, %v758_v49  ;;  %v688_v54 = vadd.f32 %v687_v52, %v2547_v26 }
 0x696   :  { %v555_v2 = vsel %vm242_vm8, %v554_v0, -inf }
 0x697   :  { %v760_v53 = vmul.f32 1.442695, %v759_v51  ;;  %v689_v59 = vsel %vm242_vm8, %v688_v54, -inf }
 0x699   :  { %2133 = vpow2.f32 %v760_v53 }
 0x69a   :  { %2135 = vpow2.f32 %v626_v61 }
 0x69f   :  { %v2564_v63 = vpop.eup %2133 }
 0x6a0   :  { %v762_v1 = vsel %vm242_vm8, %v2564_v63, 0.0  ;;  %v2136_v3 = vpop.eup %2135 }
 0x6a1   :  { %v628_v4 = vsel %vm242_vm8, %v2136_v3, 0.0 }
 0x6ab   :  { %690 = vmax.xlane.f32.xlu2 %v689_v59  ;;  %v904_v59 = vld [vmem:[%s2994_s13 + $0x8] sm:$0xff] }
 0x6b3   :  { %763 = vadd.xlane.f32.xlu2 %v762_v1 }
 0x6b4   :  { %556 = vmax.xlane.f32.xlu0 %v555_v2 }
 0x6bc   :  { %629 = vadd.xlane.f32.xlu0 %v628_v4 }
 0x6cb   :  { %566 = vrot.lane.b32.xlu2 %v2507_v41, %s2237_s0 }
 0x6d0   :  { %633 = vrot.lane.b32.xlu0 %v2507_v41, %s3014_s2  ;;  %s3036_s2 = smov 112  }
 0x6d8   :  { %700 = vrot.lane.b32.xlu0 %v2507_v41, %s2241_s26 }
 0x6dc   :  { %v510_v9 = vpop.permute.xlu2 %509 }
 0x6dd   :  { %v520_v10 = vsel %vm242_vm8, %v2525_v62, %v510_v9 }
 0x6fc   :  { %v514_v13 = vpop.permute.xlu0 %513 }
 0x6fd   :  { %v522_v14 = vsel %vm521_vm12, %v520_v10, %v514_v13  ;;  %v2637_v10 = vld [vmem:[%s2993_s12] ss:$0 sm:$0xff] }
 0x6fe   :  { %v524_v15 = vsel %vm523_vm13, %v522_v14, %v518_v48 }
 0x6ff   :  { %2004 = vmatmul.msk.f32.vlgmr.msrb.gmra.mxu0 %vm136_vm2, %v524_v15 }
 0x71e   :  { %v691_v16 = vpop.xlane.xlu2 %690 }
 0x71f   :  { %v692_v17 = vsub.f32 %v688_v54, %v691_v16 }
 0x721   :  { %v693_v18 = vmul.f32 1.442695, %v692_v17 }
 0x723   :  { %2137 = vpow2.f32 %v693_v18 }
 0x726   :  { %v764_v19 = vpop.xlane.xlu2 %763 }
 0x727   :  { %v557_v20 = vpop.xlane.xlu0 %556 }
 0x728   :  { %v558_v21 = vsub.f32 %v554_v0, %v557_v20 }
 0x729   :  { %v2138_v22 = vpop.eup %2137 }
 0x72a   :  { %v559_v23 = vmul.f32 1.442695, %v558_v21  ;;  %v695_v24 = vsel %vm242_vm8, %v2138_v22, 0.0  ;;  %v965_v21 = vld [vmem:[%s2996_s15 + $0x38] sm:$0xff] }
 0x72b   :  { %696 = vadd.xlane.f32.xlu1 %v695_v24  ;;  %985 = vmatpush.msra.mxu3 %v965_v21  ;;  %v962_v24 = vld [vmem:[%s2996_s15 + $0x20] sm:$0xff] }
 0x72c   :  { %2139 = vpow2.f32 %v559_v23  ;;  %v963_v23 = vld [vmem:[%s2996_s15 + $0x28] sm:$0xff] }
 0x72e   :  { %v567_v62 = vpop.permute.xlu2 %566 }
 0x72f   :  { %587 = vmatpush.msra.mxu1 %v567_v62  ;;  %v630_v28 = vpop.xlane.xlu0 %629  ;;  %v961_v62 = vld [vmem:[%s2996_s15 + $0x18] sm:$0xff] }
 0x730   :  { %2141 = vrcp.f32 %v630_v28  ;;  %v958_v28 = vld [vmem:[%s2996_s15] sm:$0xff] }
 0x732   :  { %v2140_v25 = vpop.eup %2139 }
 0x733   :  { %v561_v27 = vsel %vm242_vm8, %v2140_v25, 0.0 }
 0x734   :  { %562 = vadd.xlane.f32.xlu1 %v561_v27  ;;  %v959_v27 = vld [vmem:[%s2996_s15 + $0x8] sm:$0xff] }
 0x736   :  { %v2142_v29 = vpop.eup %2141 }
 0x737   :  { %v632_v30 = vmul.f32 %v2142_v29, %v2136_v3  ;;  %v2673_v29 = vld [vmem:[%s2995_s14] ss:$0 sm:$0xff] }
 0x742   :  { %v634_v32 = vpop.permute.xlu0 %633 }
 0x743   :  { %654 = vmatpush.msrb.mxu2 %v634_v32 }
 0x744   :  { %1997 = vmatmul.msk.f32.vlgmr.msrb.gmra.mxu2 %vm242_vm8, %v632_v30 }
 0x74a   :  { %v701_v34 = vpop.permute.xlu0 %700 }
 0x74b   :  { %721 = vmatpush.msrb.mxu1 %v701_v34 }
 0x74d   :  { %767 = vrot.lane.b32.xlu1 %v2507_v41, %s2244_s25 }
 0x77c   :  { %v839_v36 = vpop.f32.mrf.mxu0 }
 0x77d   :  { %v840_v37 = vadd.f32 %v2602_v35, %v839_v36 }
 0x77f   :  { %v845_v11 = vadd.f32 %v840_v37, %v2444_v58 }
 0x781   :  { %v849_v38 = vsel %vm136_vm2, %v845_v11, 0.0 }
 0x782   :  { %850 = vadd.xlane.f32.xlu0 %v849_v38 }
 0x79e   :  { %v697_v39 = vpop.xlane.xlu1 %696 }
 0x7a7   :  { %v563_v40 = vpop.xlane.xlu1 %562 }
 0x7a8   :  { %2143 = vrcp.f32 %v563_v40 }
 0x7a9   :  { %2145 = vrcp.f32 %v697_v39 }
 0x7aa   :  { %2147 = vrcp.f32 %v764_v19 }
 0x7ae   :  { %v2144_v42 = vpop.eup %2143 }
 0x7af   :  { %v565_v43 = vmul.f32 %v2144_v42, %v2140_v25  ;;  %v2146_v41 = vpop.eup %2145  ;;  %v960_v25 = vld [vmem:[%s2996_s15 + $0x10] sm:$0xff] }
 0x7b0   :  { %v699_v44 = vmul.f32 %v2146_v41, %v2138_v22  ;;  %v2148_v45 = vpop.eup %2147  ;;  %v964_v22 = vld [vmem:[%s2996_s15 + $0x30] sm:$0xff] }
 0x7b1   :  { %1994 = vmatmul.msk.f32.vlgmr.msra.gmra.mxu1 %vm242_vm8, %v565_v43  ;;  %v766_v46 = vmul.f32 %v2148_v45, %v2564_v63  ;;  %986 = vmatpush.msra.mxu3 %v964_v22 }
 0x7b2   :  { %929 = vmatpush.msra.mxu1 %v906_v56 }
 0x7b3   :  { %987 = vmatpush.msra.mxu3 %v963_v23 }
 0x7b4   :  { %930 = vmatpush.msra.mxu1 %v905_v57 }
 0x7b5   :  { %988 = vmatpush.msra.mxu3 %v962_v24 }
 0x7b6   :  { %931 = vmatpush.msra.mxu1 %v904_v59 }
 0x7b7   :  { %989 = vmatpush.msra.mxu3 %v961_v62  ;;  %v2711_v62 = vld [vmem:[%s2998_s17] ss:$0 sm:$0xff] }
 0x7b8   :  { %932 = vmatpush.msra.mxu1 %v903_v60 }
 0x7b9   :  { %2000 = vmatmul.msk.f32.vlgmr.msrb.gmra.mxu1 %vm242_vm8, %v699_v44  ;;  %990 = vmatpush.msra.mxu3 %v960_v25 }
 0x7bb   :  { %991 = vmatpush.msra.mxu3 %v959_v27 }
 0x7bd   :  { %992 = vmatpush.msra.mxu3 %v958_v28  ;;  %v2716_v28 = vld [vmem:[%s2999_s18] ss:$0 sm:$0xff] }
 0x7bf   :  { %v768_v58 = vpop.permute.xlu1 %767 }
 0x7c0   :  { %788 = vmatpush.msra.mxu2 %v768_v58  ;;  %v2683_v58 = vld [vmem:[%s3033_s30] ss:$0 sm:$0xff] }
 0x7c1   :  { %2003 = vmatmul.msk.f32.vlgmr.msra.gmra.mxu2 %vm242_vm8, %v766_v46 }
 0x7c7   :  { %v656_v47 = vpop.f32.mrf.mxu2 }
 0x7c8   :  { %794 = vrot.lane.b32.xlu1 %v656_v47, %s3012_s3 }
 0x7f5   :  { %v851_v48 = vpop.xlane.xlu0 %850 }
 0x7f6   :  { %v855_v49 = vmul.f32 %v851_v48, %v2412_v31 }
 0x7f8   :  { %v857_v50 = vsub.f32 %v845_v11, %v855_v49 }
 0x7fa   :  { %v859_v51 = vmul.f32 %v857_v50, %v857_v50 }
 0x7fc   :  { %v861_v52 = vsel %vm136_vm2, %v859_v51, 0.0 }
 0x7fd   :  { %862 = vadd.xlane.f32.xlu2 %v861_v52 }
 0x82e   :  { %v589_v53 = vpop.f32.mrf.mxu1 }
 0x836   :  { %v723_v54 = vpop.f32.mrf.mxu1 }
 0x837   :  { %798 = vrot.lane.b32.xlu1 %v723_v54, %s3018_s16 }
 0x83a   :  { %v795_v15 = vpop.permute.xlu1 %794 }
 0x83b   :  { %v805_v17 = vsel %vm242_vm8, %v589_v53, %v795_v15  ;;  %v2012_v15 = vld [vmem:[%s2988_s7 + $0x30] sm:$0xff] }
 0x844   :  { %v790_v55 = vpop.f32.mrf.mxu2 }
 0x845   :  { %802 = vrot.lane.b32.xlu1 %v790_v55, %s3016_s27 }
 0x870   :  { %v863_v61 = vpop.xlane.xlu2 %862 }
 0x871   :  { %v867_v63 = vmul.f32 %v863_v61, %v2412_v31 }
 0x873   :  { %v869_v0 = vadd.f32 1e-12, %v867_v63 }
 0x875   :  { %2149 = vrsqrt.f32 %v869_v0  ;;  %vm877_vm15 = vweird.f32 %v869_v0 }
 0x87b   :  { %v2150_v1 = vpop.eup %2149 }
 0x87c   :  { %v872_v2 = vmul.f32 %v2150_v1, %v869_v0  ;;  %vm878_vm14 = vweird.f32 %v2150_v1 }
 0x87d   :  { %vm879_vm0 = vmor %vm877_vm15, %vm878_vm14 }
 0x87e   :  { %v873_v3 = vmul.f32 %v2150_v1, %v872_v2 }
 0x880   :  { %v874_v4 = vmul.f32 0.5, %v873_v3 }
 0x882   :  { %v875_v5 = vsub.f32 1.5, %v874_v4 }
 0x884   :  { %v876_v6 = vmul.f32 %v2150_v1, %v875_v5 }
 0x886   :  { %v880_v8 = vsel %vm879_vm0, %v2150_v1, %v876_v6 }
 0x887   :  { %v891_v9 = vmul.f32 %v880_v8, %v857_v50 }
 0x889   :  { %v896_v13 = vmul.f32 %v2632_v7, %v891_v9 }
 0x88b   :  { %v901_v14 = vadd.f32 %v2637_v10, %v896_v13 }
 0x88d   :  { %2006 = vmatmul.msk.f32.vlgmr.msra.gmra.mxu1 %vm136_vm2, %v901_v14 }
 0x8a9   :  { %v799_v16 = vpop.permute.xlu1 %798 }
 0x8aa   :  { %v806_v18 = vsel %vm521_vm12, %v805_v17, %v799_v16  ;;  %v2011_v16 = vld [vmem:[%s2988_s7 + $0x28] sm:$0xff] }
 0x8b7   :  { %v803_v19 = vpop.permute.xlu1 %802 }
 0x8b8   :  { %v807_v20 = vsel %vm523_vm13, %v806_v18, %v803_v19 }
 0x8b9   :  { %2005 = vmatmul.msk.f32.gmra.mxu0 %vm136_vm2, %v807_v20 }
 0x90a   :  { %v934_v30 = vpop.f32.mrf.mxu1 }
 0x90b   :  { %v935_v32 = vadd.f32 %v2673_v29, %v934_v30 }
 0x90d   :  { %v940_v34 = vmul.f32 %v935_v32, %v935_v32 }
 0x90f   :  { %v942_v36 = vmul.f32 %v940_v34, %v935_v32 }
 0x911   :  { %v944_v37 = vmul.f32 0.044715, %v942_v36 }
 0x913   :  { %v946_v11 = vadd.f32 %v944_v37, %v935_v32 }
 0x915   :  { %v948_v38 = vmul.f32 0.7978846, %v946_v11 }
 0x917   :  { %2151 = vtanh.f32 %v948_v38 }
 0x91d   :  { %v2152_v39 = vpop.eup %2151 }
 0x91e   :  { %v952_v40 = vadd.f32 1.0, %v2152_v39 }
 0x920   :  { %v954_v42 = vmul.f32 0.5, %v952_v40 }
 0x922   :  { %v956_v43 = vmul.f32 %v954_v42, %v935_v32 }
 0x924   :  { %2008 = vmatmul.msk.f32.vlgmr.msra.gmra.mxu3 %vm970_vm1, %v956_v43 }
 0x936   :  { %v842_v41 = vpop.f32.mrf.mxu0 }
 0x937   :  { %v843_v44 = vadd.f32 %v2602_v35, %v842_v41 }
 0x939   :  { %v846_v45 = vadd.f32 %v843_v44, %v2496_v33 }
 0x93b   :  { %v852_v46 = vsel %vm136_vm2, %v846_v45, 0.0 }
 0x93c   :  { %853 = vadd.xlane.f32.xlu1 %v852_v46 }
 0x9a7   :  { %v994_v47 = vpop.f32.mrf.mxu3 }
 0x9a8   :  { %v995_v48 = vadd.f32 %v2683_v58, %v994_v47 }
 0x9aa   :  { %v1000_v49 = vadd.f32 %v995_v48, %v901_v14  ;;  %v2013_v14 = vld [vmem:[%s2988_s7 + $0x38] sm:$0xff] }
 0x9ab   :  { %1086 = vmatpush.msrb.mxu2 %v2013_v14 }
 0x9ac   :  { %v1004_v50 = vsel %vm136_vm2, %v1000_v49, 0.0 }
 0x9ad   :  { %1005 = vadd.xlane.f32.xlu2 %v1004_v50  ;;  %1087 = vmatpush.msrb.mxu2 %v2012_v15 }
 0x9af   :  { %v854_v51 = vpop.xlane.xlu1 %853  ;;  %1088 = vmatpush.msrb.mxu2 %v2011_v16 }
 0x9b0   :  { %v856_v35 = vmul.f32 %v854_v51, %v2412_v31 }
 0x9b2   :  { %v858_v52 = vsub.f32 %v846_v45, %v856_v35  ;;  %v2729_v45 = vld [vmem:[%s2989_s8 + $0x1] ss:$0 sm:$0xff]  ;;  %s3034_s8 = smov 104  }
 0x9b4   :  { %v860_v33 = vmul.f32 %v858_v52, %v858_v52 }
 0x9b6   :  { %v864_v53 = vsel %vm136_vm2, %v860_v33, 0.0 }
 0x9b7   :  { %865 = vadd.xlane.f32.xlu0 %v864_v53 }
 0xa20   :  { %v1006_v54 = vpop.xlane.xlu2 %1005 }
 0xa21   :  { %v1010_v55 = vmul.f32 %v1006_v54, %v2412_v31 }
 0xa23   :  { %v1012_v56 = vsub.f32 %v1000_v49, %v1010_v55 }
 0xa25   :  { %v1014_v57 = vmul.f32 %v1012_v56, %v1012_v56 }
 0xa27   :  { %v1016_v59 = vsel %vm136_vm2, %v1014_v57, 0.0 }
 0xa28   :  { %1017 = vadd.xlane.f32.xlu0 %v1016_v59 }
 0xa2a   :  { %v866_v60 = vpop.xlane.xlu0 %865 }
 0xa2b   :  { %v868_v61 = vmul.f32 %v866_v60, %v2412_v31 }
 0xa2d   :  { %v870_v63 = vadd.f32 1e-12, %v868_v61 }
 0xa2f   :  { %2153 = vrsqrt.f32 %v870_v63  ;;  %vm887_vm4 = vweird.f32 %v870_v63 }
 0xa35   :  { %v2154_v0 = vpop.eup %2153 }
 0xa36   :  { %v882_v1 = vmul.f32 %v2154_v0, %v870_v63  ;;  %vm888_vm3 = vweird.f32 %v2154_v0 }
 0xa37   :  { %vm889_vm5 = vmor %vm887_vm4, %vm888_vm3 }
 0xa38   :  { %v883_v2 = vmul.f32 %v2154_v0, %v882_v1 }
 0xa3a   :  { %v884_v3 = vmul.f32 0.5, %v883_v2 }
 0xa3c   :  { %v885_v4 = vsub.f32 1.5, %v884_v3 }
 0xa3e   :  { %v886_v5 = vmul.f32 %v2154_v0, %v885_v4 }
 0xa40   :  { %v890_v6 = vsel %vm889_vm5, %v2154_v0, %v886_v5 }
 0xa41   :  { %v892_v8 = vmul.f32 %v890_v6, %v858_v52 }
 0xa43   :  { %v897_v9 = vmul.f32 %v2632_v7, %v892_v8  ;;  %v2010_v7 = vld [vmem:[%s2988_s7 + $0x20] sm:$0xff] }
 0xa44   :  { %1089 = vmatpush.msrb.mxu2 %v2010_v7 }
 0xa45   :  { %v902_v13 = vadd.f32 %v2637_v10, %v897_v9 }
 0xa47   :  { %2007 = vmatmul.msk.f32.gmra.mxu1 %vm136_vm2, %v902_v13 }
 0xa9b   :  { %v1018_v10 = vpop.xlane.xlu0 %1017 }
 0xa9c   :  { %v1022_v17 = vmul.f32 %v1018_v10, %v2412_v31 }
 0xa9e   :  { %v1024_v18 = vadd.f32 1e-12, %v1022_v17 }
 0xaa0   :  { %2155 = vrsqrt.f32 %v1024_v18  ;;  %vm1032_vm7 = vweird.f32 %v1024_v18 }
 0xaa6   :  { %v2156_v19 = vpop.eup %2155 }
 0xaa7   :  { %v1027_v20 = vmul.f32 %v2156_v19, %v1024_v18  ;;  %vm1033_vm6 = vweird.f32 %v2156_v19 }
 0xaa8   :  { %vm1034_vm9 = vmor %vm1032_vm7, %vm1033_vm6 }
 0xaa9   :  { %v1028_v21 = vmul.f32 %v2156_v19, %v1027_v20 }
 0xaab   :  { %v1029_v22 = vmul.f32 0.5, %v1028_v21 }
 0xaad   :  { %v1030_v23 = vsub.f32 1.5, %v1029_v22 }
 0xaaf   :  { %v1031_v24 = vmul.f32 %v2156_v19, %v1030_v23 }
 0xab1   :  { %v1035_v25 = vsel %vm1034_vm9, %v2156_v19, %v1031_v24 }
 0xab2   :  { %v1046_v27 = vmul.f32 %v1035_v25, %v1012_v56 }
 0xab4   :  { %v1051_v30 = vmul.f32 %v2711_v62, %v1046_v27 }
 0xab6   :  { %v2720_v32 = vadd.f32 %v2716_v28, %v1051_v30 }
 0xab8   :  { %2015 = vmatmul.msk.f32.vlgmr.msrb.gmra.mxu2 %vm136_vm2, %v2720_v32 }
 0xac4   :  { %v937_v34 = vpop.f32.mrf.mxu1 }
 0xac5   :  { %v938_v36 = vadd.f32 %v2673_v29, %v937_v34 }
 0xac7   :  { %v941_v37 = vmul.f32 %v938_v36, %v938_v36 }
 0xac9   :  { %v943_v11 = vmul.f32 %v941_v37, %v938_v36 }
 0xacb   :  { %v945_v38 = vmul.f32 0.044715, %v943_v11 }
 0xacd   :  { %v947_v39 = vadd.f32 %v945_v38, %v938_v36 }
 0xacf   :  { %v949_v40 = vmul.f32 0.7978846, %v947_v39 }
 0xad1   :  { %2157 = vtanh.f32 %v949_v40 }
 0xad7   :  { %v2158_v42 = vpop.eup %2157 }
 0xad8   :  { %v953_v43 = vadd.f32 1.0, %v2158_v42 }
 0xada   :  { %v955_v41 = vmul.f32 0.5, %v953_v43 }
 0xadc   :  { %v957_v44 = vmul.f32 %v955_v41, %v938_v36 }
 0xade   :  { %2009 = vmatmul.msk.f32.gmra.mxu3 %vm970_vm1, %v957_v44 }
 0xb3b   :  { %v1091_v46 = vpop.f32.mrf.mxu2 }
 0xb3c   :  { %v2732_v29 = vadd.f32 %v2729_v45, %v1091_v46 }
 0xb3e   :  { %1163 = vrot.lane.b32.xlu1 %v2732_v29, %s2240_s1  ;;  %1098 = vrot.lane.b32.xlu0 %v2732_v29, %s2235_s28 }
 0xb46   :  { %1137 = vrot.lane.b32.xlu0 %v2732_v29, %s2237_s0 }
 0xb4e   :  { %1232 = vrot.lane.b32.xlu0 %v2732_v29, %s2236_s29 }
 0xb56   :  { %1299 = vrot.lane.b32.xlu0 %v2732_v29, %s2238_s4 }
 0xb5e   :  { %1297 = vrot.lane.b32.xlu0 %v2732_v29, %s3034_s8 }
 0xb61   :  { %v997_v47 = vpop.f32.mrf.mxu3 }
 0xb62   :  { %v998_v48 = vadd.f32 %v2683_v58, %v997_v47 }
 0xb64   :  { %v1001_v49 = vadd.f32 %v998_v48, %v902_v13 }
 0xb66   :  { %v1007_v50 = vsel %vm136_vm2, %v1001_v49, 0.0 }
 0xb67   :  { %1008 = vadd.xlane.f32.xlu2 %v1007_v50 }
 0xbb0   :  { %v1099_v51 = vpop.permute.xlu0 %1098  ;;  %v1164_v19 = vpop.permute.xlu1 %1163 }
 0xbb1   :  { %2017 = vmatpush.xpose.msk.msra.mxu0 %vm242_vm8, %v1099_v51 }
 0xbb4   :  { %2018 = vmatmul.msk.f32.vlgmr.msra.gmra.mxu0 %vm242_vm8, %v2732_v29 }
 0xbb8   :  { %v1138_v35 = vpop.permute.xlu0 %1137 }
 0xbb9   :  { %1158 = vmatpush.msrb.mxu1 %v1138_v35 }
 0xbc0   :  { %v1233_v52 = vpop.permute.xlu0 %1232 }
 0xbc1   :  { %2023 = vmatpush.xpose.msk.msra.mxu1 %vm242_vm8, %v1233_v52 }
 0xbc8   :  { %v1300_v17 = vpop.permute.xlu0 %1299 }
 0xbd0   :  { %v1298_v21 = vpop.permute.xlu0 %1297 }
 0xbda   :  { %v1009_v33 = vpop.xlane.xlu2 %1008 }
 0xbdb   :  { %v1011_v53 = vmul.f32 %v1009_v33, %v2412_v31 }
 0xbdd   :  { %v1013_v54 = vsub.f32 %v1001_v49, %v1011_v53 }
 0xbdf   :  { %v1015_v58 = vmul.f32 %v1013_v54, %v1013_v54 }
 0xbe1   :  { %v1019_v55 = vsel %vm136_vm2, %v1015_v58, 0.0 }
 0xbe2   :  { %1020 = vadd.xlane.f32.xlu2 %v1019_v55 }
 0xc31   :  { %v1121_v56 = vpop.f32.mrf.mxu0 }
 0xc32   :  { %v1124_v57 = vmul.f32 0.35355338, %v1121_v56 }
 0xc34   :  { %v1125_v59 = vadd.f32 %v1124_v57, %v2483_v12 }
 0xc36   :  { %v1126_v60 = vsel %vm242_vm8, %v1125_v59, -inf }
 0xc37   :  { %1127 = vmax.xlane.f32.xlu2 %v1126_v60 }
 0xc4f   :  { %1165 = vrot.lane.b32.xlu2 %v2732_v29, %s3035_s22 }
 0xc55   :  { %v1021_v61 = vpop.xlane.xlu2 %1020 }
 0xc56   :  { %v1023_v63 = vmul.f32 %v1021_v61, %v2412_v31 }
 0xc57   :  { %1230 = vrot.lane.b32.xlu2 %v2732_v29, %s3036_s2 }
 0xc58   :  { %v1025_v0 = vadd.f32 1e-12, %v1023_v63 }
 0xc5a   :  { %2159 = vrsqrt.f32 %v1025_v0  ;;  %vm1042_vm11 = vweird.f32 %v1025_v0 }
 0xc60   :  { %v2160_v1 = vpop.eup %2159 }
 0xc61   :  { %v1037_v2 = vmul.f32 %v2160_v1, %v1025_v0  ;;  %vm1043_vm10 = vweird.f32 %v2160_v1 }
 0xc62   :  { %vm1044_vm14 = vmor %vm1042_vm11, %vm1043_vm10  ;;  %vm1923_vm10 = vcmask 1040384   ;;  %vm1956_vm11 = vcmask 58368  }
 0xc63   :  { %v1038_v3 = vmul.f32 %v2160_v1, %v1037_v2 }
 0xc65   :  { %v1039_v4 = vmul.f32 0.5, %v1038_v3 }
 0xc67   :  { %v1040_v5 = vsub.f32 1.5, %v1039_v4 }
 0xc69   :  { %v1041_v6 = vmul.f32 %v2160_v1, %v1040_v5 }
 0xc6b   :  { %v1045_v8 = vsel %vm1044_vm14, %v2160_v1, %v1041_v6 }
 0xc6c   :  { %v1047_v9 = vmul.f32 %v1045_v8, %v1013_v54 }
 0xc6e   :  { %v1052_v13 = vmul.f32 %v2711_v62, %v1047_v9 }
 0xc70   :  { %v2763_v14 = vadd.f32 %v2716_v28, %v1052_v13 }
 0xc72   :  { %2016 = vmatmul.msk.f32.gmra.mxu2 %vm136_vm2, %v2763_v14 }
 0xcaa   :  { %v1128_v15 = vpop.xlane.xlu2 %1127 }
 0xcab   :  { %v1129_v16 = vsub.f32 %v1125_v59, %v1128_v15 }
 0xcad   :  { %v1130_v7 = vmul.f32 1.442695, %v1129_v16 }
 0xcaf   :  { %2161 = vpow2.f32 %v1130_v7 }
 0xcb2   :  { %v1166_v10 = vpop.permute.xlu2 %1165 }
 0xcb3   :  { %2020 = vmatpush.xpose.msk.msra.mxu2 %vm242_vm8, %v1166_v10 }
 0xcb5   :  { %v2162_v18 = vpop.eup %2161 }
 0xcb6   :  { %2021 = vmatmul.msk.f32.vlgmr.msra.gmra.mxu2 %vm242_vm8, %v1164_v19  ;;  %v1132_v20 = vsel %vm242_vm8, %v2162_v18, 0.0 }
 0xcb7   :  { %2026 = vmatpush.xpose.msk.msrb.mxu2 %vm242_vm8, %v1300_v17  ;;  %1133 = vadd.xlane.f32.xlu1 %v1132_v20 }
 0xcba   :  { %v1231_v30 = vpop.permute.xlu2 %1230 }
 0xcbe   :  { %2027 = vmatmul.msk.f32.vlgmr.msrb.gmra.mxu2 %vm242_vm8, %v1298_v21 }
 0xcf5   :  { %v1094_v22 = vpop.f32.mrf.mxu2 }
 0xcf6   :  { %v2773_v23 = vadd.f32 %v2729_v45, %v1094_v22 }
 0xcf8   :  { %1445 = vrot.lane.b32.xlu0 %v2773_v23, %s2240_s1  ;;  %1380 = vrot.lane.b32.xlu2 %v2773_v23, %s2235_s28  ;;  %s3037_s28 = smov 56  }
 0xcf9   :  { %1447 = vrot.lane.b32.xlu1 %v2773_v23, %s3035_s22 }
 0xd00   :  { %1512 = vrot.lane.b32.xlu0 %v2773_v23, %s3036_s2  ;;  %1514 = vrot.lane.b32.xlu2 %v2773_v23, %s2236_s29  ;;  %s3038_s29 = smov 8  }
 0xd01   :  { %1581 = vrot.lane.b32.xlu1 %v2773_v23, %s2238_s4  ;;  %s3040_s4 = smov 24  }
 0xd08   :  { %1579 = vrot.lane.b32.xlu2 %v2773_v23, %s3034_s8 }
 0xd2a   :  { %v1134_v24 = vpop.xlane.xlu1 %1133 }
 0xd2b   :  { %2163 = vrcp.f32 %v1134_v24 }
 0xd31   :  { %v2164_v62 = vpop.eup %2163 }
 0xd32   :  { %v1136_v25 = vmul.f32 %v2164_v62, %v2162_v18 }
 0xd34   :  { %2019 = vmatmul.msk.f32.vlgmr.msrb.gmra.mxu1 %vm242_vm8, %v1136_v25 }
 0xd39   :  { %v1188_v27 = vpop.f32.mrf.mxu2 }
 0xd3a   :  { %v1191_v28 = vmul.f32 0.35355338, %v1188_v27 }
 0xd3c   :  { %2024 = vmatmul.msk.f32.vlgmr.msra.gmra.mxu1 %vm242_vm8, %v1231_v30  ;;  %v1192_v34 = vadd.f32 %v1191_v28, %v2483_v12 }
 0xd3e   :  { %v1193_v36 = vsel %vm242_vm8, %v1192_v34, -inf }
 0xd3f   :  { %1194 = vmax.xlane.f32.xlu1 %v1193_v36 }
 0xd41   :  { %v1322_v37 = vpop.f32.mrf.mxu2 }
 0xd42   :  { %v1325_v11 = vmul.f32 0.35355338, %v1322_v37 }
 0xd44   :  { %v1326_v38 = vadd.f32 %v1325_v11, %v2483_v12 }
 0xd46   :  { %v1327_v39 = vsel %vm242_vm8, %v1326_v38, -inf }
 0xd47   :  { %1328 = vmax.xlane.f32.xlu2 %v1327_v39 }
 0xd52   :  { %v1381_v40 = vpop.permute.xlu2 %1380 }
 0xd53   :  { %2029 = vmatpush.xpose.msk.msrb.mxu1 %vm242_vm8, %v1381_v40 }
 0xd56   :  { %2030 = vmatmul.msk.f32.vlgmr.msrb.gmra.mxu1 %vm242_vm8, %v2773_v23 }
 0xd5a   :  { %v1515_v42 = vpop.permute.xlu2 %1514 }
 0xd5b   :  { %2035 = vmatpush.xpose.msk.msra.mxu1 %vm242_vm8, %v1515_v42 }
 0xd5f   :  { %1338 = vrot.lane.b32.xlu2 %v2732_v29, %s2244_s25 }
 0xd62   :  { %v1580_v46 = vpop.permute.xlu2 %1579 }
 0xd6a   :  { %v1446_v43 = vpop.permute.xlu0 %1445 }
 0xd6b   :  { %v1448_v41 = vpop.permute.xlu1 %1447 }
 0xd6c   :  { %2032 = vmatpush.xpose.msk.msra.mxu2 %vm242_vm8, %v1448_v41 }
 0xd6f   :  { %2033 = vmatmul.msk.f32.vlgmr.msra.gmra.mxu2 %vm242_vm8, %v1446_v43 }
 0xd72   :  { %v1513_v44 = vpop.permute.xlu0 %1512 }
 0xd73   :  { %v1582_v45 = vpop.permute.xlu1 %1581  ;;  %2036 = vmatmul.msk.f32.vlgmr.msra.gmra.mxu1 %vm242_vm8, %v1513_v44 }
 0xd74   :  { %2038 = vmatpush.xpose.msk.msrb.mxu2 %vm242_vm8, %v1582_v45 }
 0xd77   :  { %2039 = vmatmul.msk.f32.vlgmr.msrb.gmra.mxu2 %vm242_vm8, %v1580_v46 }
 0xdb1   :  { %v2806_v47 = vpop.f32.mrf.mxu1 }
 0xdb2   :  { %v1195_v48 = vpop.xlane.xlu1 %1194 }
 0xdb3   :  { %v1196_v49 = vsub.f32 %v1192_v34, %v1195_v48 }
 0xdb5   :  { %v1197_v50 = vmul.f32 1.442695, %v1196_v49 }
 0xdb7   :  { %2165 = vpow2.f32 %v1197_v50 }
 0xdb9   :  { %v1255_v35 = vpop.f32.mrf.mxu1 }
 0xdba   :  { %v1329_v51 = vpop.xlane.xlu2 %1328  ;;  %v1258_v54 = vmul.f32 0.35355338, %v1255_v35 }
 0xdbb   :  { %v1330_v52 = vsub.f32 %v1326_v38, %v1329_v51 }
 0xdbc   :  { %v1259_v55 = vadd.f32 %v1258_v54, %v2483_v12 }
 0xdbd   :  { %v2808_v33 = vpop.eup %2165  ;;  %v1331_v53 = vmul.f32 1.442695, %v1330_v52 }
 0xdbe   :  { %v1199_v58 = vsel %vm242_vm8, %v2808_v33, 0.0  ;;  %v1260_v57 = vsel %vm242_vm8, %v1259_v55, -inf }
 0xdbf   :  { %2167 = vpow2.f32 %v1331_v53  ;;  %1200 = vadd.xlane.f32.xlu0 %v1199_v58 }
 0xdc2   :  { %v1339_v25 = vpop.permute.xlu2 %1338 }
 0xdc5   :  { %v2813_v56 = vpop.eup %2167 }
 0xdc6   :  { %v1333_v59 = vsel %vm242_vm8, %v2813_v56, 0.0 }
 0xdc7   :  { %1261 = vmax.xlane.f32.xlu0 %v1260_v57  ;;  %1334 = vadd.xlane.f32.xlu1 %v1333_v59 }
 0xdd3   :  { %v1403_v60 = vpop.f32.mrf.mxu1 }
 0xdd4   :  { %v1406_v61 = vmul.f32 0.35355338, %v1403_v60 }
 0xdd6   :  { %v1407_v63 = vadd.f32 %v1406_v61, %v2547_v26 }
 0xdd8   :  { %v1408_v0 = vsel %vm242_vm8, %v1407_v63, -inf }
 0xdd9   :  { %1409 = vmax.xlane.f32.xlu1 %v1408_v0 }
 0xdf0   :  { %v1537_v1 = vpop.f32.mrf.mxu1 }
 0xdf1   :  { %v1540_v2 = vmul.f32 0.35355338, %v1537_v1 }
 0xdf2   :  { %v1470_v3 = vpop.f32.mrf.mxu2  ;;  %1271 = vrot.lane.b32.xlu1 %v2732_v29, %s2241_s26 }
 0xdf3   :  { %v1473_v12 = vmul.f32 0.35355338, %v1470_v3  ;;  %v1541_v4 = vadd.f32 %v1540_v2, %v2547_v26 }
 0xdf5   :  { %v1542_v5 = vsel %vm242_vm8, %v1541_v4, -inf  ;;  %v1474_v6 = vadd.f32 %v1473_v12, %v2547_v26 }
 0xdf6   :  { %1543 = vmax.xlane.f32.xlu2 %v1542_v5 }
 0xdf7   :  { %v1475_v8 = vsel %vm242_vm8, %v1474_v6, -inf }
 0xdf8   :  { %1476 = vmax.xlane.f32.xlu0 %v1475_v8 }
 0xdfa   :  { %v1604_v9 = vpop.f32.mrf.mxu2 }
 0xdfb   :  { %v1607_v13 = vmul.f32 0.35355338, %v1604_v9 }
 0xdfd   :  { %v1608_v15 = vadd.f32 %v1607_v13, %v2547_v26 }
 0xdff   :  { %v1609_v16 = vsel %vm242_vm8, %v1608_v15, -inf }
 0xe0c   :  { %1204 = vrot.lane.b32.xlu0 %v2732_v29, %s3037_s28 }
 0xe1c   :  { %1610 = vmax.xlane.f32.xlu1 %v1609_v16  ;;  %v2044_v16 = vld [vmem:[%s2990_s9 + $0x38] sm:$0xff] }
 0xe1d   :  { %1689 = vmatpush.msrb.mxu1 %v2044_v16 }
 0xe32   :  { %v1201_v7 = vpop.xlane.xlu0 %1200 }
 0xe35   :  { %1419 = vrot.lane.b32.xlu1 %v2773_v23, %s2237_s0  ;;  %s3039_s0 = smov 16  }
 0xe3a   :  { %v1262_v10 = vpop.xlane.xlu0 %1261  ;;  %v1335_v19 = vpop.xlane.xlu1 %1334 }
 0xe3b   :  { %v1263_v17 = vsub.f32 %v1259_v55, %v1262_v10  ;;  %v2042_v10 = vld [vmem:[%s2990_s9 + $0x28] sm:$0xff] }
 0xe3d   :  { %v1264_v18 = vmul.f32 1.442695, %v1263_v17  ;;  %v2041_v17 = vld [vmem:[%s2990_s9 + $0x20] sm:$0xff] }
 0xe3f   :  { %2169 = vpow2.f32 %v1264_v18 }
 0xe45   :  { %v2170_v20 = vpop.eup %2169 }
 0xe46   :  { %v1266_v21 = vsel %vm242_vm8, %v2170_v20, 0.0 }
 0xe47   :  { %1267 = vadd.xlane.f32.xlu2 %v1266_v21 }
 0xe4c   :  { %v1410_v29 = vpop.xlane.xlu1 %1409 }
 0xe4d   :  { %v1411_v22 = vsub.f32 %v1407_v63, %v1410_v29 }
 0xe4f   :  { %v1412_v24 = vmul.f32 1.442695, %v1411_v22 }
 0xe51   :  { %2171 = vpow2.f32 %v1412_v24 }
 0xe57   :  { %v2172_v26 = vpop.eup %2171 }
 0xe58   :  { %v1414_v62 = vsel %vm242_vm8, %v2172_v26, 0.0 }
 0xe59   :  { %1415 = vadd.xlane.f32.xlu2 %v1414_v62 }
 0xe64   :  { %v1272_v27 = vpop.permute.xlu1 %1271 }
 0xe65   :  { %1292 = vmatpush.msrb.mxu3 %v1272_v27 }
 0xe69   :  { %v1544_v28 = vpop.xlane.xlu2 %1543 }
 0xe6a   :  { %v1545_v30 = vsub.f32 %v1541_v4, %v1544_v28 }
 0xe6b   :  { %v1477_v34 = vpop.xlane.xlu0 %1476 }
 0xe6c   :  { %v1546_v36 = vmul.f32 1.442695, %v1545_v30  ;;  %v1478_v37 = vsub.f32 %v1474_v6, %v1477_v34 }
 0xe6e   :  { %2173 = vpow2.f32 %v1546_v36  ;;  %v1479_v11 = vmul.f32 1.442695, %v1478_v37 }
 0xe70   :  { %2175 = vpow2.f32 %v1479_v11 }
 0xe71   :  { %2177 = vrcp.f32 %v1201_v7  ;;  %v2043_v7 = vld [vmem:[%s2990_s9 + $0x30] sm:$0xff] }
 0xe72   :  { %2179 = vrcp.f32 %v1335_v19  ;;  %1690 = vmatpush.msrb.mxu1 %v2043_v7 }
 0xe74   :  { %v2174_v38 = vpop.eup %2173  ;;  %1691 = vmatpush.msrb.mxu1 %v2042_v10 }
 0xe75   :  { %v1548_v39 = vsel %vm242_vm8, %v2174_v38, 0.0 }
 0xe76   :  { %v2176_v40 = vpop.eup %2175  ;;  %1549 = vadd.xlane.f32.xlu0 %v1548_v39  ;;  %1692 = vmatpush.msrb.mxu1 %v2041_v17 }
 0xe77   :  { %v1481_v42 = vsel %vm242_vm8, %v2176_v40, 0.0  ;;  %v2178_v43 = vpop.eup %2177 }
 0xe78   :  { %1482 = vadd.xlane.f32.xlu2 %v1481_v42  ;;  %v1203_v41 = vmul.f32 %v2178_v43, %v2808_v33  ;;  %v2180_v45 = vpop.eup %2179 }
 0xe79   :  { %v1337_v46 = vmul.f32 %v2180_v45, %v2813_v56 }
 0xe7e   :  { %v1205_v44 = vpop.permute.xlu0 %1204 }
 0xe7f   :  { %1225 = vmatpush.msrb.mxu0 %v1205_v44 }
 0xe80   :  { %2022 = vmatmul.msk.f32.vlgmr.msrb.gmra.mxu0 %vm242_vm8, %v1203_v41 }
 0xe81   :  { %1359 = vmatpush.msra.mxu0 %v1339_v25 }
 0xe88   :  { %2028 = vmatmul.msk.f32.vlgmr.msra.gmra.mxu0 %vm242_vm8, %v1337_v46 }
 0xe8f   :  { %v1611_v48 = vpop.xlane.xlu1 %1610 }
 0xe90   :  { %1486 = vrot.lane.b32.xlu2 %v2773_v23, %s3037_s28  ;;  %v1612_v49 = vsub.f32 %v1608_v15, %v1611_v48 }
 0xe92   :  { %v1613_v50 = vmul.f32 1.442695, %v1612_v49 }
 0xe94   :  { %2181 = vpow2.f32 %v1613_v50 }
 0xe98   :  { %1553 = vrot.lane.b32.xlu2 %v2773_v23, %s2241_s26 }
 0xe9a   :  { %v2182_v51 = vpop.eup %2181 }
 0xe9b   :  { %v1615_v35 = vsel %vm242_vm8, %v2182_v51, 0.0 }
 0xe9c   :  { %1616 = vadd.xlane.f32.xlu1 %v1615_v35  ;;  %v2052_v35 = vld [vmem:[%s2994_s13 + $0x30] sm:$0xff] }
 0xea0   :  { %1620 = vrot.lane.b32.xlu2 %v2773_v23, %s2244_s25 }
 0xea7   :  { %v1420_v52 = vpop.permute.xlu1 %1419 }
 0xea8   :  { %1440 = vmatpush.msra.mxu3 %v1420_v52  ;;  %v2051_v52 = vld [vmem:[%s2994_s13 + $0x28] sm:$0xff] }
 0xeba   :  { %v1268_v33 = vpop.xlane.xlu2 %1267 }
 0xebb   :  { %2183 = vrcp.f32 %v1268_v33  ;;  %v2050_v33 = vld [vmem:[%s2994_s13 + $0x20] sm:$0xff] }
 0xec1   :  { %v2184_v53 = vpop.eup %2183 }
 0xec2   :  { %v1270_v54 = vmul.f32 %v2184_v53, %v2170_v20 }
 0xec4   :  { %2025 = vmatmul.msk.f32.vlgmr.msrb.gmra.mxu3 %vm242_vm8, %v1270_v54 }
 0xecc   :  { %v1416_v58 = vpop.xlane.xlu2 %1415 }
 0xecd   :  { %2185 = vrcp.f32 %v1416_v58 }
 0xed3   :  { %v2186_v55 = vpop.eup %2185 }
 0xed4   :  { %v1418_v56 = vmul.f32 %v2186_v55, %v2172_v26 }
 0xed6   :  { %2031 = vmatmul.msk.f32.vlgmr.msra.gmra.mxu3 %vm242_vm8, %v1418_v56 }
 0xee9   :  { %v1550_v59 = vpop.xlane.xlu0 %1549 }
 0xeeb   :  { %v1483_v57 = vpop.xlane.xlu2 %1482 }
 0xeec   :  { %2187 = vrcp.f32 %v1483_v57 }
 0xeed   :  { %2189 = vrcp.f32 %v1550_v59 }
 0xef2   :  { %v2188_v60 = vpop.eup %2187 }
 0xef3   :  { %v1485_v23 = vmul.f32 %v2188_v60, %v2176_v40  ;;  %v1487_v61 = vpop.permute.xlu2 %1486  ;;  %v2190_v63 = vpop.eup %2189 }
 0xef4   :  { %1507 = vmatpush.msrb.mxu0 %v1487_v61  ;;  %v1552_v0 = vmul.f32 %v2190_v63, %v2174_v38  ;;  %v2104_v61 = vld [vmem:[%s2992_s11 + $0x1] ss:$0 sm:$0xff] }
 0xef5   :  { %2034 = vmatmul.msk.f32.vlgmr.msrb.gmra.mxu0 %vm242_vm8, %v1485_v23 }
 0xefb   :  { %v1554_v1 = vpop.permute.xlu2 %1553 }
 0xefc   :  { %1574 = vmatpush.msrb.mxu3 %v1554_v1  ;;  %v2105_v1 = vld [vmem:[%s2993_s12 + $0x1] ss:$0 sm:$0xff] }
 0xefd   :  { %v1227_v2 = vpop.f32.mrf.mxu0  ;;  %2037 = vmatmul.msk.f32.vlgmr.msrb.gmra.mxu3 %vm242_vm8, %v1552_v0 }
 0xefe   :  { %1365 = vrot.lane.b32.xlu0 %v1227_v2, %s3038_s29 }
 0xf03   :  { %v1621_v3 = vpop.permute.xlu2 %1620 }
 0xf04   :  { %1641 = vmatpush.msra.mxu0 %v1621_v3 }
 0xf05   :  { %v1361_v8 = vpop.f32.mrf.mxu0 }
 0xf0f   :  { %v1617_v12 = vpop.xlane.xlu1 %1616 }
 0xf10   :  { %2191 = vrcp.f32 %v1617_v12 }
 0xf16   :  { %v2192_v4 = vpop.eup %2191 }
 0xf17   :  { %v1619_v5 = vmul.f32 %v2192_v4, %v2182_v51 }
 0xf19   :  { %2040 = vmatmul.msk.f32.vlgmr.msra.gmra.mxu0 %vm242_vm8, %v1619_v5 }
 0xf47   :  { %v1294_v6 = vpop.f32.mrf.mxu3 }
 0xf48   :  { %1369 = vrot.lane.b32.xlu2 %v1294_v6, %s3039_s0 }
 0xf50   :  { %1373 = vrot.lane.b32.xlu2 %v1361_v8, %s3040_s4 }
 0xf59   :  { %v1442_v13 = vpop.f32.mrf.mxu3 }
 0xf70   :  { %v1366_v20 = vpop.permute.xlu0 %1365 }
 0xf71   :  { %v1376_v21 = vsel %vm242_vm8, %v2806_v47, %v1366_v20  ;;  %v2103_v47 = vld [vmem:[%s2991_s10 + $0x1] ss:$0 sm:$0xff]  ;;  %v2063_v20 = vld [vmem:[%s2996_s15 + $0x70] sm:$0xff] }
 0xf72   :  { %v1509_v9 = vpop.f32.mrf.mxu0 }
 0xf73   :  { %1647 = vrot.lane.b32.xlu1 %v1509_v9, %s3038_s29 }
 0xf80   :  { %v1576_v15 = vpop.f32.mrf.mxu3 }
 0xf81   :  { %1651 = vrot.lane.b32.xlu0 %v1576_v15, %s3039_s0 }
 0xf96   :  { %v1643_v18 = vpop.f32.mrf.mxu0 }
 0xf97   :  { %1655 = vrot.lane.b32.xlu2 %v1643_v18, %s3040_s4 }
 0xfa2   :  { %v1370_v19 = vpop.permute.xlu2 %1369 }
 0xfa3   :  { %v1377_v29 = vsel %vm521_vm12, %v1376_v21, %v1370_v19  ;;  %v2064_v19 = vld [vmem:[%s2996_s15 + $0x78] sm:$0xff]  ;;  %v2062_v21 = vld [vmem:[%s2996_s15 + $0x68] sm:$0xff] }
 0xfa4   :  { %1845 = vmatpush.msra.mxu2 %v2064_v19 }
 0xfa6   :  { %1846 = vmatpush.msra.mxu2 %v2063_v20 }
 0xfa8   :  { %1847 = vmatpush.msra.mxu2 %v2062_v21 }
 0xfaa   :  { %v1374_v22 = vpop.permute.xlu2 %1373 }
 0xfab   :  { %v1378_v24 = vsel %vm523_vm13, %v1377_v29, %v1374_v22  ;;  %v2061_v29 = vld [vmem:[%s2996_s15 + $0x60] sm:$0xff]  ;;  %v2060_v22 = vld [vmem:[%s2996_s15 + $0x58] sm:$0xff] }
 0xfac   :  { %2046 = vmatmul.msk.f32.vlgmr.msrb.gmra.mxu1 %vm136_vm2, %v1378_v24  ;;  %1848 = vmatpush.msra.mxu2 %v2061_v29  ;;  %v2059_v24 = vld [vmem:[%s2996_s15 + $0x50] sm:$0xff] }
 0xfae   :  { %1849 = vmatpush.msra.mxu2 %v2060_v22 }
 0xfb0   :  { %1850 = vmatpush.msra.mxu2 %v2059_v24 }
 0xfe5   :  { %v1648_v26 = vpop.permute.xlu1 %1647 }
 0xfe6   :  { %v1658_v62 = vsel %vm242_vm8, %v1442_v13, %v1648_v26  ;;  %v2058_v26 = vld [vmem:[%s2996_s15 + $0x48] sm:$0xff] }
 0xfe7   :  { %1851 = vmatpush.msra.mxu2 %v2058_v26 }
 0xff1   :  { %v1656_v27 = vpop.permute.xlu2 %1655 }
 0xff3   :  { %v1652_v25 = vpop.permute.xlu0 %1651 }
 0xff4   :  { %v1659_v28 = vsel %vm521_vm12, %v1658_v62, %v1652_v25  ;;  %v2057_v62 = vld [vmem:[%s2996_s15 + $0x40] sm:$0xff] }
 0xff5   :  { %v1660_v30 = vsel %vm523_vm13, %v1659_v28, %v1656_v27  ;;  %1852 = vmatpush.msra.mxu2 %v2057_v62  ;;  %v2106_v25 = vld [vmem:[%s2995_s14 + $0x1] ss:$0 sm:$0xff] }
 0xff6   :  { %2047 = vmatmul.msk.f32.gmra.mxu1 %vm136_vm2, %v1660_v30 }
0x1029   :  { %v1694_v34 = vpop.f32.mrf.mxu1 }
0x102a   :  { %v1695_v36 = vadd.f32 %v2103_v47, %v1694_v34 }
0x102c   :  { %v1700_v37 = vadd.f32 %v1695_v36, %v2720_v32 }
0x102e   :  { %v1706_v11 = vsel %vm136_vm2, %v1700_v37, 0.0 }
0x102f   :  { %1707 = vadd.xlane.f32.xlu0 %v1706_v11 }
0x1073   :  { %v1697_v38 = vpop.f32.mrf.mxu1 }
0x1074   :  { %v1698_v39 = vadd.f32 %v2103_v47, %v1697_v38 }
0x1076   :  { %v1701_v40 = vadd.f32 %v1698_v39, %v2763_v14  ;;  %v2053_v14 = vld [vmem:[%s2994_s13 + $0x38] sm:$0xff] }
0x1077   :  { %1788 = vmatpush.msra.mxu3 %v2053_v14  ;;  %v2107_v14 = vld [vmem:[%s3033_s30 + $0x1] ss:$0 sm:$0xff] }
0x1078   :  { %v1709_v42 = vsel %vm136_vm2, %v1701_v40, 0.0 }
0x1079   :  { %1710 = vadd.xlane.f32.xlu2 %v1709_v42  ;;  %1789 = vmatpush.msra.mxu3 %v2052_v35 }
0x107b   :  { %1790 = vmatpush.msra.mxu3 %v2051_v52 }
0x107d   :  { %1791 = vmatpush.msra.mxu3 %v2050_v33 }
0x10a2   :  { %v1708_v43 = vpop.xlane.xlu0 %1707 }
0x10a3   :  { %v1712_v41 = vmul.f32 %v1708_v43, %v2412_v31 }
0x10a5   :  { %v1714_v44 = vsub.f32 %v1700_v37, %v1712_v41 }
0x10a7   :  { %v1716_v45 = vmul.f32 %v1714_v44, %v1714_v44 }
0x10a9   :  { %v1718_v46 = vsel %vm136_vm2, %v1716_v45, 0.0 }
0x10aa   :  { %1719 = vadd.xlane.f32.xlu1 %v1718_v46 }
0x10ec   :  { %v1711_v48 = vpop.xlane.xlu2 %1710 }
0x10ed   :  { %v1713_v32 = vmul.f32 %v1711_v48, %v2412_v31 }
0x10ef   :  { %v1715_v49 = vsub.f32 %v1701_v40, %v1713_v32 }
0x10f1   :  { %v1717_v50 = vmul.f32 %v1715_v49, %v1715_v49 }
0x10f3   :  { %v1721_v51 = vsel %vm136_vm2, %v1717_v50, 0.0 }
0x10f4   :  { %1722 = vadd.xlane.f32.xlu0 %v1721_v51 }
0x111d   :  { %v1720_v53 = vpop.xlane.xlu1 %1719 }
0x111e   :  { %v1724_v54 = vmul.f32 %v1720_v53, %v2412_v31 }
0x1120   :  { %v1726_v58 = vadd.f32 1e-12, %v1724_v54 }
0x1122   :  { %2193 = vrsqrt.f32 %v1726_v58  ;;  %vm1734_vm12 = vweird.f32 %v1726_v58 }
0x1128   :  { %v2194_v55 = vpop.eup %2193 }
0x1129   :  { %v1729_v56 = vmul.f32 %v2194_v55, %v1726_v58  ;;  %vm1735_vm8 = vweird.f32 %v2194_v55 }
0x112a   :  { %vm1736_vm13 = vmor %vm1734_vm12, %vm1735_vm8 }
0x112b   :  { %v1730_v57 = vmul.f32 %v2194_v55, %v1729_v56 }
0x112d   :  { %v1731_v59 = vmul.f32 0.5, %v1730_v57 }
0x112f   :  { %v1732_v60 = vsub.f32 1.5, %v1731_v59 }
0x1131   :  { %v1733_v23 = vmul.f32 %v2194_v55, %v1732_v60 }
0x1133   :  { %v1737_v63 = vsel %vm1736_vm13, %v2194_v55, %v1733_v23 }
0x1134   :  { %v1748_v0 = vmul.f32 %v1737_v63, %v1714_v44 }
0x1136   :  { %v1753_v2 = vmul.f32 %v2104_v61, %v1748_v0 }
0x1138   :  { %v2909_v3 = vadd.f32 %v2105_v1, %v1753_v2 }
0x113a   :  { %2055 = vmatmul.msk.f32.vlgmr.msra.gmra.mxu3 %vm136_vm2, %v2909_v3 }
0x1167   :  { %v1723_v12 = vpop.xlane.xlu0 %1722 }
0x1168   :  { %v1725_v4 = vmul.f32 %v1723_v12, %v2412_v31 }
0x116a   :  { %v1727_v5 = vadd.f32 1e-12, %v1725_v4 }
0x116c   :  { %2195 = vrsqrt.f32 %v1727_v5  ;;  %vm1744_vm0 = vweird.f32 %v1727_v5 }
0x1172   :  { %v2196_v6 = vpop.eup %2195 }
0x1173   :  { %v1739_v8 = vmul.f32 %v2196_v6, %v1727_v5  ;;  %vm1745_vm15 = vweird.f32 %v2196_v6 }
0x1174   :  { %vm1746_vm3 = vmor %vm1744_vm0, %vm1745_vm15 }
0x1175   :  { %v1740_v9 = vmul.f32 %v2196_v6, %v1739_v8  ;;  %v1927_v8 = vld [vmem:[%s3000_s19 + $0x10] sm:$0xff] }
0x1177   :  { %v1741_v13 = vmul.f32 0.5, %v1740_v9 }
0x1179   :  { %v1742_v15 = vsub.f32 1.5, %v1741_v13  ;;  %v1926_v13 = vld [vmem:[%s3000_s19 + $0x8] sm:$0xff] }
0x117b   :  { %v1743_v16 = vmul.f32 %v2196_v6, %v1742_v15  ;;  %v1925_v15 = vld [vmem:[%s3000_s19] sm:$0xff] }
0x117d   :  { %v1747_v7 = vsel %vm1746_vm3, %v2196_v6, %v1743_v16  ;;  %v1928_v6 = vld [vmem:[%s3000_s19 + $0x18] sm:$0xff] }
0x117e   :  { %v1749_v10 = vmul.f32 %v1747_v7, %v1715_v49  ;;  %1948 = vmatpush.msrb.mxu0 %v1928_v6 }
0x1180   :  { %v1754_v17 = vmul.f32 %v2104_v61, %v1749_v10  ;;  %1949 = vmatpush.msrb.mxu0 %v1927_v8 }
0x1182   :  { %v1759_v18 = vadd.f32 %v2105_v1, %v1754_v17  ;;  %1950 = vmatpush.msrb.mxu0 %v1926_v13 }
0x1184   :  { %2056 = vmatmul.msk.f32.gmra.mxu3 %vm136_vm2, %v1759_v18  ;;  %1951 = vmatpush.msrb.mxu0 %v1925_v15 }
0x11bd   :  { %v1793_v27 = vpop.f32.mrf.mxu3 }
0x11be   :  { %v1794_v28 = vadd.f32 %v2106_v25, %v1793_v27 }
0x11c0   :  { %v1799_v30 = vmul.f32 %v1794_v28, %v1794_v28 }
0x11c2   :  { %v1801_v47 = vmul.f32 %v1799_v30, %v1794_v28 }
0x11c4   :  { %v1803_v34 = vmul.f32 0.044715, %v1801_v47 }
0x11c6   :  { %v1805_v36 = vadd.f32 %v1803_v34, %v1794_v28 }
0x11c8   :  { %v1807_v37 = vmul.f32 0.7978846, %v1805_v36 }
0x11ca   :  { %2197 = vtanh.f32 %v1807_v37  ;;  %v2109_v37 = vld [vmem:[%s2999_s18 + $0x1] ss:$0 sm:$0xff] }
0x11d0   :  { %v2198_v11 = vpop.eup %2197 }
0x11d1   :  { %v1811_v38 = vadd.f32 1.0, %v2198_v11 }
0x11d3   :  { %v1813_v39 = vmul.f32 0.5, %v1811_v38 }
0x11d5   :  { %v1815_v40 = vmul.f32 %v1813_v39, %v1794_v28 }
0x11d7   :  { %2066 = vmatmul.msk.f32.vlgmr.msra.gmra.mxu2 %vm970_vm1, %v1815_v40 }
0x1207   :  { %v1796_v42 = vpop.f32.mrf.mxu3 }
0x1208   :  { %v1797_v43 = vadd.f32 %v2106_v25, %v1796_v42  ;;  %v2110_v42 = vld [vmem:[%s3001_s20] ss:$0 sm:$0xff] }
0x120a   :  { %v1800_v41 = vmul.f32 %v1797_v43, %v1797_v43 }
0x120c   :  { %v1802_v44 = vmul.f32 %v1800_v41, %v1797_v43 }
0x120e   :  { %v1804_v45 = vmul.f32 0.044715, %v1802_v44 }
0x1210   :  { %v1806_v46 = vadd.f32 %v1804_v45, %v1797_v43 }
0x1212   :  { %v1808_v48 = vmul.f32 0.7978846, %v1806_v46 }
0x1214   :  { %2199 = vtanh.f32 %v1808_v48 }
0x121a   :  { %v2200_v32 = vpop.eup %2199 }
0x121b   :  { %v1812_v49 = vadd.f32 1.0, %v2200_v32 }
0x121d   :  { %v1814_v50 = vmul.f32 0.5, %v1812_v49 }
0x121f   :  { %v1816_v51 = vmul.f32 %v1814_v50, %v1797_v43 }
0x1221   :  { %2067 = vmatmul.msk.f32.gmra.mxu2 %vm970_vm1, %v1816_v51 }
0x125a   :  { %v1854_v35 = vpop.f32.mrf.mxu2 }
0x125b   :  { %v1855_v52 = vadd.f32 %v2107_v14, %v1854_v35 }
0x125d   :  { %v1860_v33 = vadd.f32 %v1855_v52, %v2909_v3 }
0x125f   :  { %v1866_v53 = vsel %vm136_vm2, %v1860_v33, 0.0 }
0x1260   :  { %1867 = vadd.xlane.f32.xlu0 %v1866_v53 }
0x12a4   :  { %v1857_v54 = vpop.f32.mrf.mxu2 }
0x12a5   :  { %v1858_v58 = vadd.f32 %v2107_v14, %v1857_v54 }
0x12a7   :  { %v1861_v55 = vadd.f32 %v1858_v58, %v1759_v18 }
0x12a9   :  { %v1869_v56 = vsel %vm136_vm2, %v1861_v55, 0.0 }
0x12aa   :  { %1870 = vadd.xlane.f32.xlu2 %v1869_v56 }
0x12d3   :  { %v1868_v57 = vpop.xlane.xlu0 %1867 }
0x12d4   :  { %v1872_v59 = vmul.f32 %v1868_v57, %v2412_v31 }
0x12d6   :  { %v1874_v60 = vsub.f32 %v1860_v33, %v1872_v59 }
0x12d8   :  { %v1876_v23 = vmul.f32 %v1874_v60, %v1874_v60 }
0x12da   :  { %v1878_v61 = vsel %vm136_vm2, %v1876_v23, 0.0 }
0x12db   :  { %1879 = vadd.xlane.f32.xlu1 %v1878_v61 }
0x131d   :  { %v1871_v63 = vpop.xlane.xlu2 %1870 }
0x131e   :  { %v1873_v0 = vmul.f32 %v1871_v63, %v2412_v31 }
0x1320   :  { %v1875_v1 = vsub.f32 %v1861_v55, %v1873_v0 }
0x1322   :  { %v1877_v2 = vmul.f32 %v1875_v1, %v1875_v1 }
0x1324   :  { %v1881_v3 = vsel %vm136_vm2, %v1877_v2, 0.0 }
0x1325   :  { %1882 = vadd.xlane.f32.xlu2 %v1881_v3 }
0x134e   :  { %v1880_v12 = vpop.xlane.xlu1 %1879 }
0x134f   :  { %v1884_v4 = vmul.f32 %v1880_v12, %v2412_v31 }
0x1351   :  { %v1886_v5 = vadd.f32 1e-12, %v1884_v4 }
0x1353   :  { %2201 = vrsqrt.f32 %v1886_v5  ;;  %vm1894_vm4 = vweird.f32 %v1886_v5 }
0x1359   :  { %v2202_v9 = vpop.eup %2201 }
0x135a   :  { %v1889_v16 = vmul.f32 %v2202_v9, %v1886_v5  ;;  %vm1895_vm1 = vweird.f32 %v2202_v9 }
0x135b   :  { %vm1896_vm5 = vmor %vm1894_vm4, %vm1895_vm1 }
0x135c   :  { %v1890_v17 = vmul.f32 %v2202_v9, %v1889_v16 }
0x135e   :  { %v1891_v19 = vmul.f32 0.5, %v1890_v17 }
0x1360   :  { %v1892_v20 = vsub.f32 1.5, %v1891_v19 }
0x1362   :  { %v1893_v22 = vmul.f32 %v2202_v9, %v1892_v20 }
0x1364   :  { %v1897_v62 = vsel %vm1896_vm5, %v2202_v9, %v1893_v22 }
0x1365   :  { %v1908_v28 = vmul.f32 %v1897_v62, %v1874_v60 }
0x1398   :  { %v1883_v7 = vpop.xlane.xlu2 %1882 }
0x1399   :  { %v1885_v10 = vmul.f32 %v1883_v7, %v2412_v31  ;;  %v2108_v31 = vld [vmem:[%s2998_s17 + $0x1] ss:$0 sm:$0xff]  ;;  %s2248_s17 = smov [#allocation2]  }
0x139a   :  { %v1913_v34 = vmul.f32 %v2108_v31, %v1908_v28  ;;  %s1963_s5 = sshll.u32 %s2248_s17, 4  ;;  %s1964_s5 = int_to_ptr.vmem [resolvable:$true] %s1963_s5 }
0x139b   :  { %v1887_v18 = vadd.f32 1e-12, %v1885_v10 }
0x139c   :  { %v1918_v38 = vadd.f32 %v2109_v37, %v1913_v34 }
0x139d   :  { %2203 = vrsqrt.f32 %v1887_v18  ;;  %vm1904_vm7 = vweird.f32 %v1887_v18 }
0x13a3   :  { %v2204_v21 = vpop.eup %2203 }
0x13a4   :  { %v1899_v29 = vmul.f32 %v2204_v21, %v1887_v18  ;;  %vm1905_vm6 = vweird.f32 %v2204_v21 }
0x13a5   :  { %vm1906_vm9 = vmor %vm1904_vm7, %vm1905_vm6 }
0x13a6   :  { %v1900_v24 = vmul.f32 %v2204_v21, %v1899_v29 }
0x13a8   :  { %v1901_v26 = vmul.f32 0.5, %v1900_v24 }
0x13aa   :  { %v1902_v25 = vsub.f32 1.5, %v1901_v26 }
0x13ac   :  { %v1903_v27 = vmul.f32 %v2204_v21, %v1902_v25 }
0x13ae   :  { %v1907_v30 = vsel %vm1906_vm9, %v2204_v21, %v1903_v27 }
0x13af   :  { %v1909_v47 = vmul.f32 %v1907_v30, %v1875_v1 }
0x13b1   :  { %v1914_v36 = vmul.f32 %v2108_v31, %v1909_v47 }
0x13b3   :  { %v1919_v11 = vadd.f32 %v2109_v37, %v1914_v36 }
0x13b5   :  { %v1921_v39 = vrot.slane %v1919_v11, 7 }
0x13b7   :  { %v1924_v40 = vsel %vm1923_vm10, %v1918_v38, %v1921_v39 }
0x13b8   :  { %2070 = vmatmul.msk.f32.vlgmr.msrb.gmra.mxu0 %vm136_vm2, %v1924_v40 }
0x1435   :  { %v1953_v43 = vpop.f32.mrf.mxu0 }
0x1436   :  { %v1954_v41 = vadd.f32 %v2110_v42, %v1953_v43 }
0x1438   :  { %1957 = vst.msk [vmem:[#allocation2] sm:$0x3] %vm1956_vm11, %v1954_v41 }
0x1439   :  { %1968 = dma.vmem_to_hbm [thread:$0]  %s1964_s5, 32, %s1966_s6, [#allocation3]  }
0x143a   :  { %2229 = dma.done.wait [#allocation3], 32  }
0x143b   :  { %2230 = vsyncadd [#allocation3], 4294967264 }
0x143c   :  { %1973 = vsyncpa [#allocation3], 1 }

</bundles_post_ra>
